<compile_context>
chip_gen: v7x
topology: tpu7x:2x2x1
jax: 0.10.0
libtpu: 0.0.40
codegen_flags: <defaults>
</compile_context>

<pallas_src>
import functools
import math

import jax
import jax.numpy as jnp
from jax.experimental import pallas as pl
from jax.experimental.pallas import tpu as pltpu


# MXU-native matmul dtype (f32 accumulate via preferred_element_type).
_MATMUL_DTYPE = jnp.bfloat16
# Storage dtype for the q/k/v and attention-output HBM intermediates.
_INTERMEDIATE_DTYPE = jnp.bfloat16


def _vmem_limit_bytes():
    # ~3/4 of physical VMEM, capped at 100 MiB (adapts to v7x's 64 MiB).
    try:
        cap = pltpu.get_tpu_info().vmem_capacity_bytes
    except Exception:
        cap = 64 * 1024 * 1024
    return int(min(100 * 1024 * 1024, cap * 3 // 4))


_VMEM_LIMIT = _vmem_limit_bytes()


def _cparams(dimension_semantics):
    return pltpu.CompilerParams(
        dimension_semantics=dimension_semantics,
        vmem_limit_bytes=_VMEM_LIMIT,
    )


def _tile(dim, target):
    """Largest multiple-of-8 divisor of `dim` <= target (or dim itself if small)."""
    if dim <= target:
        return dim
    t = (target // 8) * 8
    while t >= 8:
        if dim % t == 0:
            return t
        t -= 8
    raise ValueError(
        f"dim={dim} has no multiple-of-8 tile <= {target}; pad the sequence / "
        "row dimension to a multiple of 8 before calling the kernels")


def _tile_lanes(dim, target):
    """Largest multiple-of-128 divisor of `dim` <= target (dim is 128-aligned)."""
    t = min(dim, (target // 128) * 128)
    while t >= 128:
        if dim % t == 0:
            return t
        t -= 128
    return dim


def _round_up(x, m):
    return ((x + m - 1) // m) * m


def _layernorm(x, gamma, beta):
    mu = jnp.mean(x, axis=-1, keepdims=True)
    var = jnp.mean(jnp.square(x - mu), axis=-1, keepdims=True)
    return (x - mu) * jax.lax.rsqrt(var + 1e-5) * gamma + beta


# ----------------------------------------------------------------------------
# Kernels
# ----------------------------------------------------------------------------

def _ln_qkv_rope_kernel(x_ref, g_ref, b_ref, w_ref, cos_ref, sin_ref,
                        q_ref, k_ref, v_ref, *, n_heads, scale):
    # x: (TS, D) f32; w: (D, 3D) bf16; cos/sin_signed: (TS, Dh) f32
    # outputs: q/k/v blocks (H, TS, Dh) bf16 -- head-major, written per head so
    # the (b, s, h, d) -> (b, h, s, d) transpose never touches HBM.
    # The softmax 1/sqrt(Dh) scale is folded into q here; the rotate_half
    # negation is folded into the sign-flipped sin table.
    x = x_ref[...]
    h = _layernorm(x, g_ref[...], b_ref[...])
    qkv = jnp.dot(h.astype(_MATMUL_DTYPE), w_ref[...],
                  preferred_element_type=jnp.float32)          # (TS, 3D) f32
    d = x.shape[-1]
    dh = d // n_heads
    half = dh // 2
    cos = cos_ref[...]
    sin_s = sin_ref[...]                                       # sign-folded sin

    # TODO(synk): for Dh that is a multiple of 128, use pltpu.roll(t, Dh//2, -1)
    # (free XLU slot) instead of the concatenate below.
    def rot(t):  # [t[:, half:], t[:, :half]]  (negation lives in sin_s)
        return jnp.concatenate([t[:, half:], t[:, :half]], axis=-1)

    for hh in range(n_heads):
        qh = qkv[:, hh * dh:(hh + 1) * dh]
        kh = qkv[:, d + hh * dh:d + (hh + 1) * dh]
        vh = qkv[:, 2 * d + hh * dh:2 * d + (hh + 1) * dh]
        q_ref[hh] = ((qh * cos + rot(qh) * sin_s) * scale).astype(q_ref.dtype)
        k_ref[hh] = (kh * cos + rot(kh) * sin_s).astype(k_ref.dtype)
        v_ref[hh] = vh.astype(v_ref.dtype)


def _flash_attention_kernel(q_ref, k_ref, v_ref, o_ref, m_scr, l_scr, acc_scr):
    # q: (1, TQ, Dh) bf16 (pre-scaled); k, v: (1, TK, Dh) bf16
    # scratch m/l: (1, TQ, 1) f32; acc: (1, TQ, Dh) f32
    ki = pl.program_id(2)

    @pl.when(ki == 0)
    def _():
        m_scr[...] = jnp.full(m_scr.shape, -jnp.inf, jnp.float32)
        l_scr[...] = jnp.zeros(l_scr.shape, jnp.float32)
        acc_scr[...] = jnp.zeros(acc_scr.shape, jnp.float32)

    s = jnp.einsum("bqd,bkd->bqk", q_ref[...], k_ref[...],
                   preferred_element_type=jnp.float32)           # (1, TQ, TK)

    m_prev = m_scr[...]
    m_new = jnp.maximum(m_prev, jnp.max(s, axis=-1, keepdims=True))
    alpha = jnp.exp(m_prev - m_new)
    p = jnp.exp(s - m_new)
    l_scr[...] = alpha * l_scr[...] + jnp.sum(p, axis=-1, keepdims=True)
    acc_scr[...] = alpha * acc_scr[...] + jnp.einsum(
        "bqk,bkd->bqd", p.astype(v_ref.dtype), v_ref[...],
        preferred_element_type=jnp.float32)
    m_scr[...] = m_new

    @pl.when(ki == pl.num_programs(2) - 1)
    def _():
        inv_l = pl.reciprocal(l_scr[...], approx=True)
        o_ref[...] = (acc_scr[...] * inv_l).astype(o_ref.dtype)


def _attn_mlp_block_kernel(o_ref, skip_ref, wo_ref, g_ref, b_ref,
                           w1_ref, b1_ref, w2_ref, b2_ref, out_ref, *, n_heads):
    # Fused: concat heads -> attn_out proj -> +residual -> LN2 -> MLP(GELU-tanh)
    # -> +residual.  Saves a full (B*S, D) f32 HBM round trip per block.
    parts = [o_ref[h] for h in range(n_heads)]
    o2d = jnp.concatenate(parts, axis=-1)                        # (TS, D) bf16
    y = jnp.dot(o2d.astype(_MATMUL_DTYPE), wo_ref[...],
                preferred_element_type=jnp.float32)
    x_mid = skip_ref[...] + y                                    # f32 residual

    h = _layernorm(x_mid, g_ref[...], b_ref[...])
    h = jnp.dot(h.astype(_MATMUL_DTYPE), w1_ref[...],
                preferred_element_type=jnp.float32) + b1_ref[...]
    c = 0.7978845608028654  # sqrt(2/pi)
    h = 0.5 * h * (1.0 + jnp.tanh(c * (h + 0.044715 * h * h * h)))
    y2 = jnp.dot(h.astype(_MATMUL_DTYPE), w2_ref[...],
                 preferred_element_type=jnp.float32) + b2_ref[...]
    out_ref[...] = x_mid + y2


def _head_logits_lse_kernel(x_ref, g_ref, b_ref, w_ref, bias_ref,
                            logits_ref, lse_ref, h_scr, m_scr, z_scr,
                            *, n_valid, vt):
    # Pass 1 of the vocab-tiled final head: LN_final once per row tile (into
    # scratch), then per vocab tile compute logits and an online masked
    # max / sum-exp.  Writes raw logits blocks and, at the last vocab tile,
    # the per-row LSE over the first n_valid columns.
    vi = pl.program_id(1)

    @pl.when(vi == 0)
    def _():
        h_scr[...] = _layernorm(x_ref[...], g_ref[...], b_ref[...]).astype(h_scr.dtype)
        m_scr[...] = jnp.full(m_scr.shape, -1e30, jnp.float32)
        z_scr[...] = jnp.zeros(z_scr.shape, jnp.float32)

    logits = jnp.dot(h_scr[...], w_ref[...],
                     preferred_element_type=jnp.float32) + bias_ref[...]
    logits_ref[...] = logits

    col = vi * vt + jax.lax.broadcasted_iota(jnp.int32, logits.shape, 1)
    valid = col < n_valid
    masked = jnp.where(valid, logits, -1e30)
    m_prev = m_scr[...]
    m_new = jnp.maximum(m_prev, jnp.max(masked, axis=-1, keepdims=True))
    alpha = jnp.exp(m_prev - m_new)
    z_scr[...] = alpha * z_scr[...] + jnp.sum(
        jnp.where(valid, jnp.exp(masked - m_new), 0.0), axis=-1, keepdims=True)
    m_scr[...] = m_new

    @pl.when(vi == pl.num_programs(1) - 1)
    def _():
        lse_ref[...] = m_scr[...] + jnp.log(z_scr[...])


def _head_normalize_kernel(logits_ref, lse_ref, o_ref, *, n_valid, vt):
    # Pass 2: log-softmax over the first n_valid columns, pass-through elsewhere.
    vi = pl.program_id(1)
    logits = logits_ref[...]
    col = vi * vt + jax.lax.broadcasted_iota(jnp.int32, logits.shape, 1)
    o_ref[...] = jnp.where(col < n_valid, logits - lse_ref[...], logits)


# ----------------------------------------------------------------------------
# pallas_call wrappers
# ----------------------------------------------------------------------------

def ln_qkv_rope(x2d, ln_w, ln_b, qkv_w, cos, sin_s, *, batch, seq, n_heads):
    n, d = x2d.shape
    dh = d // n_heads
    ts = _tile(seq, 512)
    st = seq // ts
    scale = 1.0 / math.sqrt(dh)
    head_shape = jax.ShapeDtypeStruct((batch * n_heads, seq, dh), _INTERMEDIATE_DTYPE)
    head_spec = pl.BlockSpec((n_heads, ts, dh), lambda b, j: (b, j, 0))
    return pl.pallas_call(
        functools.partial(_ln_qkv_rope_kernel, n_heads=n_heads, scale=scale),
        grid=(batch, st),
        in_specs=[
            pl.BlockSpec((ts, d), lambda b, j: (b * st + j, 0)),
            pl.BlockSpec((1, d), lambda b, j: (0, 0)),
            pl.BlockSpec((1, d), lambda b, j: (0, 0)),
            pl.BlockSpec((d, 3 * d), lambda b, j: (0, 0)),   # resident weight
            pl.BlockSpec((ts, dh), lambda b, j: (j, 0)),
            pl.BlockSpec((ts, dh), lambda b, j: (j, 0)),
        ],
        out_specs=(head_spec, head_spec, head_spec),
        out_shape=(head_shape, head_shape, head_shape),
        compiler_params=_cparams(("parallel", "parallel")),
    )(x2d, ln_w, ln_b, qkv_w, cos, sin_s)


def flash_attention(q, k, v):
    bh, s, dh = q.shape
    tq = _tile(s, 256)
    tk = _tile(s, 256)
    grid = (bh, s // tq, s // tk)
    return pl.pallas_call(
        _flash_attention_kernel,
        grid=grid,
        in_specs=[
            pl.BlockSpec((1, tq, dh), lambda b, qi, ki: (b, qi, 0)),
            pl.BlockSpec((1, tk, dh), lambda b, qi, ki: (b, ki, 0)),
            pl.BlockSpec((1, tk, dh), lambda b, qi, ki: (b, ki, 0)),
        ],
        out_specs=pl.BlockSpec((1, tq, dh), lambda b, qi, ki: (b, qi, 0)),
        out_shape=jax.ShapeDtypeStruct((bh, s, dh), _INTERMEDIATE_DTYPE),
        scratch_shapes=[
            pltpu.VMEM((1, tq, 1), jnp.float32),
            pltpu.VMEM((1, tq, 1), jnp.float32),
            pltpu.VMEM((1, tq, dh), jnp.float32),
        ],
        compiler_params=_cparams(("parallel", "parallel", "arbitrary")),
    )(q, k, v)


def attn_mlp_block(o_heads, x_skip, out_w, ln_w, ln_b, w1, b1, w2, b2,
                   *, batch, seq, n_heads):
    n, d = x_skip.shape
    dh = d // n_heads
    dhid = w1.shape[1]
    ts = _tile(seq, 512)
    st = seq // ts
    # Weights are resident (bf16 halves the footprint).
    # TODO(synk): for very large D on v7x (64 MiB VMEM) tile the 4*D hidden
    # axis as an extra "arbitrary" grid axis with an accumulator scratch.
    return pl.pallas_call(
        functools.partial(_attn_mlp_block_kernel, n_heads=n_heads),
        grid=(batch, st),
        in_specs=[
            pl.BlockSpec((n_heads, ts, dh), lambda b, j: (b, j, 0)),
            pl.BlockSpec((ts, d), lambda b, j: (b * st + j, 0)),
            pl.BlockSpec((d, d), lambda b, j: (0, 0)),
            pl.BlockSpec((1, d), lambda b, j: (0, 0)),
            pl.BlockSpec((1, d), lambda b, j: (0, 0)),
            pl.BlockSpec((d, dhid), lambda b, j: (0, 0)),
            pl.BlockSpec((1, dhid), lambda b, j: (0, 0)),
            pl.BlockSpec((dhid, d), lambda b, j: (0, 0)),
            pl.BlockSpec((1, d), lambda b, j: (0, 0)),
        ],
        out_specs=pl.BlockSpec((ts, d), lambda b, j: (b * st + j, 0)),
        out_shape=jax.ShapeDtypeStruct((n, d), jnp.float32),
        compiler_params=_cparams(("parallel", "parallel")),
    )(o_heads, x_skip, out_w, ln_w, ln_b, w1, b1, w2, b2)


def head_logits_lse(x2d, ln_w, ln_b, w_pad, b_pad, *, n_valid):
    n, d = x2d.shape
    vp = w_pad.shape[1]
    tm = _tile(n, 256)
    vt = _tile_lanes(vp, 512)
    grid = (n // tm, vp // vt)
    return pl.pallas_call(
        functools.partial(_head_logits_lse_kernel, n_valid=n_valid, vt=vt),
        grid=grid,
        in_specs=[
            pl.BlockSpec((tm, d), lambda i, vi: (i, 0)),
            pl.BlockSpec((1, d), lambda i, vi: (0, 0)),
            pl.BlockSpec((1, d), lambda i, vi: (0, 0)),
            pl.BlockSpec((d, vt), lambda i, vi: (0, vi)),    # vocab-tiled weight
            pl.BlockSpec((1, vt), lambda i, vi: (0, vi)),
        ],
        out_specs=(pl.BlockSpec((tm, vt), lambda i, vi: (i, vi)),
                   pl.BlockSpec((tm, 1), lambda i, vi: (i, 0))),
        out_shape=(jax.ShapeDtypeStruct((n, vp), jnp.float32),
                   jax.ShapeDtypeStruct((n, 1), jnp.float32)),
        scratch_shapes=[
            pltpu.VMEM((tm, d), _MATMUL_DTYPE),
            pltpu.VMEM((tm, 1), jnp.float32),
            pltpu.VMEM((tm, 1), jnp.float32),
        ],
        compiler_params=_cparams(("parallel", "arbitrary")),
    )(x2d, ln_w, ln_b, w_pad, b_pad)


def head_normalize(logits, lse, *, n_valid):
    n, vp = logits.shape
    tm = _tile(n, 512)
    vt = _tile_lanes(vp, 512)
    grid = (n // tm, vp // vt)
    return pl.pallas_call(
        functools.partial(_head_normalize_kernel, n_valid=n_valid, vt=vt),
        grid=grid,
        in_specs=[
            pl.BlockSpec((tm, vt), lambda i, vi: (i, vi)),
            pl.BlockSpec((tm, 1), lambda i, vi: (i, 0)),
        ],
        out_specs=pl.BlockSpec((tm, vt), lambda i, vi: (i, vi)),
        out_shape=jax.ShapeDtypeStruct((n, vp), jnp.float32),
        compiler_params=_cparams(("parallel", "parallel")),
    )(logits, lse)


# ----------------------------------------------------------------------------
# Model assembly (glue is plain JAX: embedding gather and free reshapes)
# ----------------------------------------------------------------------------

def rotary_tables(seq_len, head_dim, base=10000.0):
    inv_freq = 1.0 / (base ** (jnp.arange(0, head_dim, 2, dtype=jnp.float32) / head_dim))
    t = jnp.arange(seq_len, dtype=jnp.float32)
    freqs = jnp.einsum("i,j->ij", t, inv_freq)             # (S, Dh/2)
    emb = jnp.concatenate([freqs, freqs], axis=-1)          # (S, Dh)
    cos = jnp.cos(emb)
    sin = jnp.sin(emb)
    half = head_dim // 2
    sign = jnp.concatenate([-jnp.ones((half,), jnp.float32),
                            jnp.ones((head_dim - half,), jnp.float32)])
    return cos, sin * sign                                   # sign-folded sin


def ddit_block(x2d, p, cos, sin_s, *, batch, seq, n_heads):
    q, k, v = ln_qkv_rope(x2d, p["ln1_w"], p["ln1_b"], p["qkv_w_t"], cos, sin_s,
                          batch=batch, seq=seq, n_heads=n_heads)
    o = flash_attention(q, k, v)                             # (B*H, S, Dh) bf16
    x2d = attn_mlp_block(o, x2d, p["out_w_t"], p["ln2_w"], p["ln2_b"],
                         p["mlp_w1_t"], p["mlp_b1"], p["mlp_w2_t"], p["mlp_b2"],
                         batch=batch, seq=seq, n_heads=n_heads)
    return x2d


def radd_forward(params, indices, *, n_heads, vocab):
    x = params["embedding"][indices]                         # (B, S, D) gather (glue)
    b, s, d = x.shape
    dh = d // n_heads
    cos, sin_s = rotary_tables(s, dh)
    x2d = x.reshape(b * s, d)

    for blk in params["blocks"]:
        x2d = ddit_block(x2d, blk, cos, sin_s, batch=b, seq=s, n_heads=n_heads)

    logits, lse = head_logits_lse(x2d, params["lnf_w"], params["lnf_b"],
                                  params["head_w"], params["head_b"],
                                  n_valid=vocab - 1)
    out = head_normalize(logits, lse, n_valid=vocab - 1)
    return out[:, :vocab].reshape(b, s, vocab)


# ----------------------------------------------------------------------------
# Parameter initialization (mirrors the module's __init__) + one-time prep
# ----------------------------------------------------------------------------

def init_params(key, hidden, n_heads, n_blocks, vocab, mlp_ratio=4):
    def uniform(key, shape, bound):
        return jax.random.uniform(key, shape, jnp.float32, -bound, bound)

    keys = jax.random.split(key, 1 + 6 * n_blocks)
    ki = iter(keys)

    params = {}
    # EmbeddingLayer: kaiming_uniform(a=sqrt(5)) -> bound = 1/sqrt(dim)
    params["embedding"] = uniform(next(ki), (vocab, hidden), 1.0 / math.sqrt(hidden))

    blocks = []
    for _ in range(n_blocks):
        b = {}
        b["ln1_w"] = jnp.ones((1, hidden), jnp.float32)
        b["ln1_b"] = jnp.ones((1, hidden), jnp.float32)
        b["ln2_w"] = jnp.ones((1, hidden), jnp.float32)
        b["ln2_b"] = jnp.ones((1, hidden), jnp.float32)
        bound = 1.0 / math.sqrt(hidden)
        # weights stored transposed: (in, out); qkv/attn_out have bias=False
        b["qkv_w_t"] = uniform(next(ki), (hidden, 3 * hidden), bound)
        b["out_w_t"] = uniform(next(ki), (hidden, hidden), bound)
        b["mlp_w1_t"] = uniform(next(ki), (hidden, mlp_ratio * hidden), bound)
        b["mlp_b1"] = uniform(next(ki), (1, mlp_ratio * hidden), bound)
        bound2 = 1.0 / math.sqrt(mlp_ratio * hidden)
        b["mlp_w2_t"] = uniform(next(ki), (mlp_ratio * hidden, hidden), bound2)
        b["mlp_b2"] = uniform(next(ki), (1, hidden), bound2)
        blocks.append(b)
    params["blocks"] = blocks

    # DDitFinalLayerWot (zero-initialized linear)
    params["lnf_w"] = jnp.ones((1, hidden), jnp.float32)
    params["lnf_b"] = jnp.ones((1, hidden), jnp.float32)
    params["out_w_t"] = jnp.zeros((hidden, vocab), jnp.float32)
    params["out_b"] = jnp.zeros((1, vocab), jnp.float32)
    return params


def prepare_params(params):
    """One-time prep: cast matmul weights to bf16, pad vocab head to 128-multiple."""
    md = _MATMUL_DTYPE
    prepped = {"embedding": params["embedding"],
               "lnf_w": params["lnf_w"], "lnf_b": params["lnf_b"]}
    blocks = []
    for b in params["blocks"]:
        nb = dict(b)
        for k in ("qkv_w_t", "out_w_t", "mlp_w1_t", "mlp_w2_t"):
            nb[k] = b[k].astype(md)
        blocks.append(nb)
    prepped["blocks"] = blocks

    vocab = params["out_b"].shape[-1]
    vp = _round_up(vocab, 128)                               # lane-dense width
    prepped["head_w"] = jnp.pad(params["out_w_t"],
                                ((0, 0), (0, vp - vocab))).astype(md)
    prepped["head_b"] = jnp.pad(params["out_b"], ((0, 0), (0, vp - vocab)))
    return prepped


# ----------------------------------------------------------------------------

if __name__ == "__main__":
    # small config: tokens=12 -> vocab=13, hidden=32, 4 heads (head_dim=8), 2 blocks
    B, S = 2, 8
    HIDDEN, N_HEADS, N_BLOCKS = 32, 4, 2
    TOKENS = 12
    VOCAB = TOKENS + 1

    key = jax.random.PRNGKey(0)
    kp, kx = jax.random.split(key)
    params = prepare_params(init_params(kp, HIDDEN, N_HEADS, N_BLOCKS, VOCAB))
    indices = jax.random.randint(kx, (B, S), 0, VOCAB, dtype=jnp.int32)

    fwd = jax.jit(functools.partial(radd_forward, n_heads=N_HEADS, vocab=VOCAB))
    out = fwd(params, indices)
    out = jax.block_until_ready(out)

    assert out.shape == (B, S, VOCAB), out.shape
    assert bool(jnp.all(jnp.isfinite(out)))
    # the first VOCAB-1 channels are log-probabilities -> probs sum to 1 per row
    probs_sum = jnp.sum(jnp.exp(out[..., :-1]), axis=-1)
    assert bool(jnp.allclose(probs_sum, 1.0, atol=1e-4)), probs_sum

    print("KERNEL_OK")
</pallas_src>

<mosaic_0001>
module attributes {stable_mosaic.version = 11 : i64} {
  func.func @_flash_attention_kernel(%arg0: i32, %arg1: i32, %arg2: i32, %arg3: memref<1x8x8xbf16, #tpu.memory_space<vmem>>, %arg4: memref<1x8x8xbf16, #tpu.memory_space<vmem>>, %arg5: memref<1x8x8xbf16, #tpu.memory_space<vmem>>, %arg6: memref<1x8x8xbf16, #tpu.memory_space<vmem>>, %arg7: memref<1x8x1xf32, #tpu.memory_space<vmem>>, %arg8: memref<1x8x1xf32, #tpu.memory_space<vmem>>, %arg9: memref<1x8x8xf32, #tpu.memory_space<vmem>>) attributes {dimension_semantics = [#tpu.dimension_semantics<parallel>, #tpu.dimension_semantics<parallel>, #tpu.dimension_semantics<arbitrary>], iteration_bounds = array<i64: 8, 1, 1>, scalar_prefetch = 0 : i64, scratch_operands = 3 : i64, tpu.core_type = #tpu.core_type<tc>, window_params = [{transform_indices = @transform_0, window_bounds = array<i64: 1, 8, 8>}, {transform_indices = @transform_1, window_bounds = array<i64: 1, 8, 8>}, {transform_indices = @transform_2, window_bounds = array<i64: 1, 8, 8>}, {transform_indices = @transform_3, window_bounds = array<i64: 1, 8, 8>}]} {
    %c0_i32 = arith.constant 0 : i32
    %0 = arith.cmpi eq, %arg2, %c0_i32 : i32
    %1 = arith.extui %0 : i1 to i32
    %c0_i32_0 = arith.constant 0 : i32
    %2 = arith.cmpi ne, %1, %c0_i32_0 : i32
    scf.if %2 {
      %cst_32 = arith.constant 0xFF800000 : f32
      %33 = vector.broadcast %cst_32 : f32 to vector<1x8x1xf32>
      %c0_33 = arith.constant 0 : index
      %c0_34 = arith.constant 0 : index
      %c0_35 = arith.constant 0 : index
      %34 = vector.load %arg7[%c0_33, %c0_34, %c0_35] : memref<1x8x1xf32, #tpu.memory_space<vmem>>, vector<1x8x1xf32>
      tpu.vector_store %arg7[%c0_33, %c0_34, %c0_35], %33 {strides = array<i32>} : memref<1x8x1xf32, #tpu.memory_space<vmem>>, vector<1x8x1xf32>,
      %cst_36 = arith.constant 0.000000e+00 : f32
      %35 = vector.broadcast %cst_36 : f32 to vector<1x8x1xf32>
      %c0_37 = arith.constant 0 : index
      %c0_38 = arith.constant 0 : index
      %c0_39 = arith.constant 0 : index
      %36 = vector.load %arg8[%c0_37, %c0_38, %c0_39] : memref<1x8x1xf32, #tpu.memory_space<vmem>>, vector<1x8x1xf32>
      tpu.vector_store %arg8[%c0_37, %c0_38, %c0_39], %35 {strides = array<i32>} : memref<1x8x1xf32, #tpu.memory_space<vmem>>, vector<1x8x1xf32>,
      %cst_40 = arith.constant 0.000000e+00 : f32
      %37 = vector.broadcast %cst_40 : f32 to vector<1x8x8xf32>
      %c0_41 = arith.constant 0 : index
      %c0_42 = arith.constant 0 : index
      %c0_43 = arith.constant 0 : index
      %38 = vector.load %arg9[%c0_41, %c0_42, %c0_43] : memref<1x8x8xf32, #tpu.memory_space<vmem>>, vector<1x8x8xf32>
      tpu.vector_store %arg9[%c0_41, %c0_42, %c0_43], %37 {strides = array<i32>} : memref<1x8x8xf32, #tpu.memory_space<vmem>>, vector<1x8x8xf32>,
    } else {
    }
    %c0 = arith.constant 0 : index
    %c0_1 = arith.constant 0 : index
    %c0_2 = arith.constant 0 : index
    %3 = vector.load %arg3[%c0, %c0_1, %c0_2] : memref<1x8x8xbf16, #tpu.memory_space<vmem>>, vector<1x8x8xbf16>
    %c0_3 = arith.constant 0 : index
    %c0_4 = arith.constant 0 : index
    %c0_5 = arith.constant 0 : index
    %4 = vector.load %arg4[%c0_3, %c0_4, %c0_5] : memref<1x8x8xbf16, #tpu.memory_space<vmem>>, vector<1x8x8xbf16>
    "tpu.trace_start"() <{level = 10 : i32, message = "bqd,bkd->bqk"}> : () -> ()
    %cst = arith.constant dense<0.000000e+00> : vector<1x8x8xf32>
    %5 = tpu.matmul %3, %4, %cst {dimension_numbers = #tpu.dot_dimension_numbers<[2], [2], [1], [1], [0, 0, 0, 1, 1, 1], [0], [0]>} : vector<1x8x8xbf16>, vector<1x8x8xbf16>, vector<1x8x8xf32> -> vector<1x8x8xf32>
    "tpu.trace_stop"() : () -> ()
    %c0_6 = arith.constant 0 : index
    %c0_7 = arith.constant 0 : index
    %c0_8 = arith.constant 0 : index
    %6 = vector.load %arg7[%c0_6, %c0_7, %c0_8] : memref<1x8x1xf32, #tpu.memory_space<vmem>>, vector<1x8x1xf32>
    %cst_9 = arith.constant dense<0xFF800000> : vector<1x8xf32>
    %7 = vector.multi_reduction <maximumf>, %5, %cst_9 [2] : vector<1x8x8xf32> to vector<1x8xf32>
    %8 = vector.shape_cast %7 : vector<1x8xf32> to vector<1x8x1xf32>
    %9 = arith.maximumf %6, %8 : vector<1x8x1xf32>
    %10 = arith.subf %6, %9 : vector<1x8x1xf32>
    %11 = math.exp %10 : vector<1x8x1xf32>
    %12 = vector.broadcast %9 : vector<1x8x1xf32> to vector<1x8x8xf32>
    %13 = arith.subf %5, %12 : vector<1x8x8xf32>
    %14 = math.exp %13 : vector<1x8x8xf32>
    %c0_10 = arith.constant 0 : index
    %c0_11 = arith.constant 0 : index
    %c0_12 = arith.constant 0 : index
    %15 = vector.load %arg8[%c0_10, %c0_11, %c0_12] : memref<1x8x1xf32, #tpu.memory_space<vmem>>, vector<1x8x1xf32>
    %16 = arith.mulf %11, %15 : vector<1x8x1xf32>
    %cst_13 = arith.constant dense<0.000000e+00> : vector<1x8xf32>
    %17 = vector.multi_reduction <add>, %14, %cst_13 [2] : vector<1x8x8xf32> to vector<1x8xf32>
    %18 = vector.shape_cast %17 : vector<1x8xf32> to vector<1x8x1xf32>
    %19 = arith.addf %16, %18 : vector<1x8x1xf32>
    %c0_14 = arith.constant 0 : index
    %c0_15 = arith.constant 0 : index
    %c0_16 = arith.constant 0 : index
    %20 = vector.load %arg8[%c0_14, %c0_15, %c0_16] : memref<1x8x1xf32, #tpu.memory_space<vmem>>, vector<1x8x1xf32>
    tpu.vector_store %arg8[%c0_14, %c0_15, %c0_16], %19 {strides = array<i32>} : memref<1x8x1xf32, #tpu.memory_space<vmem>>, vector<1x8x1xf32>,
    %c0_17 = arith.constant 0 : index
    %c0_18 = arith.constant 0 : index
    %c0_19 = arith.constant 0 : index
    %21 = vector.load %arg9[%c0_17, %c0_18, %c0_19] : memref<1x8x8xf32, #tpu.memory_space<vmem>>, vector<1x8x8xf32>
    %22 = vector.broadcast %11 : vector<1x8x1xf32> to vector<1x8x8xf32>
    %23 = arith.mulf %22, %21 : vector<1x8x8xf32>
    %24 = arith.truncf %14 : vector<1x8x8xf32> to vector<1x8x8xbf16>
    %c0_20 = arith.constant 0 : index
    %c0_21 = arith.constant 0 : index
    %c0_22 = arith.constant 0 : index
    %25 = vector.load %arg5[%c0_20, %c0_21, %c0_22] : memref<1x8x8xbf16, #tpu.memory_space<vmem>>, vector<1x8x8xbf16>
    "tpu.trace_start"() <{level = 10 : i32, message = "bqk,bkd->bqd"}> : () -> ()
    %cst_23 = arith.constant dense<0.000000e+00> : vector<1x8x8xf32>
    %26 = tpu.matmul %24, %25, %cst_23 {dimension_numbers = #tpu.dot_dimension_numbers<[2], [1], [1], [2], [0, 0, 0, 1, 1, 2], [0], [0]>} : vector<1x8x8xbf16>, vector<1x8x8xbf16>, vector<1x8x8xf32> -> vector<1x8x8xf32>
    "tpu.trace_stop"() : () -> ()
    %27 = arith.addf %23, %26 : vector<1x8x8xf32>
    %c0_24 = arith.constant 0 : index
    %c0_25 = arith.constant 0 : index
    %c0_26 = arith.constant 0 : index
    %28 = vector.load %arg9[%c0_24, %c0_25, %c0_26] : memref<1x8x8xf32, #tpu.memory_space<vmem>>, vector<1x8x8xf32>
    tpu.vector_store %arg9[%c0_24, %c0_25, %c0_26], %27 {strides = array<i32>} : memref<1x8x8xf32, #tpu.memory_space<vmem>>, vector<1x8x8xf32>,
    %c0_27 = arith.constant 0 : index
    %c0_28 = arith.constant 0 : index
    %c0_29 = arith.constant 0 : index
    %29 = vector.load %arg7[%c0_27, %c0_28, %c0_29] : memref<1x8x1xf32, #tpu.memory_space<vmem>>, vector<1x8x1xf32>
    tpu.vector_store %arg7[%c0_27, %c0_28, %c0_29], %9 {strides = array<i32>} : memref<1x8x1xf32, #tpu.memory_space<vmem>>, vector<1x8x1xf32>,
    %c0_i32_30 = arith.constant 0 : i32
    %30 = arith.cmpi eq, %arg2, %c0_i32_30 : i32
    %31 = arith.extui %30 : i1 to i32
    %c0_i32_31 = arith.constant 0 : i32
    %32 = arith.cmpi ne, %31, %c0_i32_31 : i32
    scf.if %32 {
      %c0_32 = arith.constant 0 : index
      %c0_33 = arith.constant 0 : index
      %c0_34 = arith.constant 0 : index
      %33 = vector.load %arg8[%c0_32, %c0_33, %c0_34] : memref<1x8x1xf32, #tpu.memory_space<vmem>>, vector<1x8x1xf32>
      %34 = tpu.reciprocal %33 {approx = true} : vector<1x8x1xf32> -> vector<1x8x1xf32>
      %c0_35 = arith.constant 0 : index
      %c0_36 = arith.constant 0 : index
      %c0_37 = arith.constant 0 : index
      %35 = vector.load %arg9[%c0_35, %c0_36, %c0_37] : memref<1x8x8xf32, #tpu.memory_space<vmem>>, vector<1x8x8xf32>
      %36 = vector.broadcast %34 : vector<1x8x1xf32> to vector<1x8x8xf32>
      %37 = arith.mulf %35, %36 : vector<1x8x8xf32>
      %38 = arith.truncf %37 : vector<1x8x8xf32> to vector<1x8x8xbf16>
      %c0_38 = arith.constant 0 : index
      %c0_39 = arith.constant 0 : index
      %c0_40 = arith.constant 0 : index
      %39 = vector.load %arg6[%c0_38, %c0_39, %c0_40] : memref<1x8x8xbf16, #tpu.memory_space<vmem>>, vector<1x8x8xbf16>
      tpu.vector_store %arg6[%c0_38, %c0_39, %c0_40], %38 {strides = array<i32>} : memref<1x8x8xbf16, #tpu.memory_space<vmem>>, vector<1x8x8xbf16>,
    } else {
    }
    return
  }
  func.func @transform_0(%arg0: i32, %arg1: i32, %arg2: i32) -> (i32, i32, i32) {
    %c0_i32 = arith.constant 0 : i32
    %c0_i32_0 = arith.constant 0 : i32
    return %arg0, %arg1, %c0_i32 : i32, i32, i32
  }
  func.func @transform_1(%arg0: i32, %arg1: i32, %arg2: i32) -> (i32, i32, i32) {
    %c0_i32 = arith.constant 0 : i32
    %c0_i32_0 = arith.constant 0 : i32
    return %arg0, %arg2, %c0_i32 : i32, i32, i32
  }
  func.func @transform_2(%arg0: i32, %arg1: i32, %arg2: i32) -> (i32, i32, i32) {
    %c0_i32 = arith.constant 0 : i32
    %c0_i32_0 = arith.constant 0 : i32
    return %arg0, %arg2, %c0_i32 : i32, i32, i32
  }
  func.func @transform_3(%arg0: i32, %arg1: i32, %arg2: i32) -> (i32, i32, i32) {
    %c0_i32 = arith.constant 0 : i32
    %c0_i32_0 = arith.constant 0 : i32
    return %arg0, %arg1, %c0_i32 : i32, i32, i32
  }
}

module attributes {stable_mosaic.version = 11 : i64} {
  func.func @_ln_qkv_rope_kernel(%arg0: i32, %arg1: i32, %arg2: memref<8x32xf32, #tpu.memory_space<vmem>>, %arg3: memref<1x32xf32, #tpu.memory_space<vmem>>, %arg4: memref<1x32xf32, #tpu.memory_space<vmem>>, %arg5: memref<32x96xbf16, #tpu.memory_space<vmem>>, %arg6: memref<8x8xf32, #tpu.memory_space<vmem>>, %arg7: memref<8x8xf32, #tpu.memory_space<vmem>>, %arg8: memref<4x8x8xbf16, #tpu.memory_space<vmem>>, %arg9: memref<4x8x8xbf16, #tpu.memory_space<vmem>>, %arg10: memref<4x8x8xbf16, #tpu.memory_space<vmem>>) attributes {dimension_semantics = [#tpu.dimension_semantics<parallel>, #tpu.dimension_semantics<parallel>], iteration_bounds = array<i64: 2, 1>, scalar_prefetch = 0 : i64, scratch_operands = 0 : i64, tpu.core_type = #tpu.core_type<tc>, window_params = [{transform_indices = @transform_0, window_bounds = array<i64: 8, 32>}, {pipeline_mode = #tpu.pipeline_mode<synchronous>, transform_indices = @transform_1, window_bounds = array<i64: 1, 32>}, {pipeline_mode = #tpu.pipeline_mode<synchronous>, transform_indices = @transform_2, window_bounds = array<i64: 1, 32>}, {pipeline_mode = #tpu.pipeline_mode<synchronous>, transform_indices = @transform_3, window_bounds = array<i64: 32, 96>}, {transform_indices = @transform_4, window_bounds = array<i64: 8, 8>}, {transform_indices = @transform_5, window_bounds = array<i64: 8, 8>}, {transform_indices = @transform_6, window_bounds = array<i64: 4, 8, 8>}, {transform_indices = @transform_7, window_bounds = array<i64: 4, 8, 8>}, {transform_indices = @transform_8, window_bounds = array<i64: 4, 8, 8>}]} {
    %c0 = arith.constant 0 : index
    %c0_0 = arith.constant 0 : index
    %0 = vector.load %arg2[%c0, %c0_0] : memref<8x32xf32, #tpu.memory_space<vmem>>, vector<8x32xf32>
    %c0_1 = arith.constant 0 : index
    %c0_2 = arith.constant 0 : index
    %1 = vector.load %arg3[%c0_1, %c0_2] : memref<1x32xf32, #tpu.memory_space<vmem>>, vector<1x32xf32>
    %c0_3 = arith.constant 0 : index
    %c0_4 = arith.constant 0 : index
    %2 = vector.load %arg4[%c0_3, %c0_4] : memref<1x32xf32, #tpu.memory_space<vmem>>, vector<1x32xf32>
    %cst = arith.constant dense<0.000000e+00> : vector<8xf32>
    %3 = vector.multi_reduction <add>, %0, %cst [1] : vector<8x32xf32> to vector<8xf32>
    %4 = vector.shape_cast %3 : vector<8xf32> to vector<8x1xf32>
    %cst_5 = arith.constant 3.200000e+01 : f32
    %5 = vector.broadcast %cst_5 : f32 to vector<8x1xf32>
    %6 = arith.divf %4, %5 : vector<8x1xf32>
    %7 = vector.broadcast %6 : vector<8x1xf32> to vector<8x32xf32>
    %8 = arith.subf %0, %7 : vector<8x32xf32>
    %9 = arith.mulf %8, %8 : vector<8x32xf32>
    %cst_6 = arith.constant dense<0.000000e+00> : vector<8xf32>
    %10 = vector.multi_reduction <add>, %9, %cst_6 [1] : vector<8x32xf32> to vector<8xf32>
    %11 = vector.shape_cast %10 : vector<8xf32> to vector<8x1xf32>
    %cst_7 = arith.constant 3.200000e+01 : f32
    %12 = vector.broadcast %cst_7 : f32 to vector<8x1xf32>
    %13 = arith.divf %11, %12 : vector<8x1xf32>
    %14 = vector.broadcast %6 : vector<8x1xf32> to vector<8x32xf32>
    %15 = arith.subf %0, %14 : vector<8x32xf32>
    %cst_8 = arith.constant 9.99999974E-6 : f32
    %16 = vector.broadcast %cst_8 : f32 to vector<8x1xf32>
    %17 = arith.addf %13, %16 : vector<8x1xf32>
    %18 = math.rsqrt %17 : vector<8x1xf32>
    %19 = vector.broadcast %18 : vector<8x1xf32> to vector<8x32xf32>
    %20 = arith.mulf %15, %19 : vector<8x32xf32>
    %21 = vector.broadcast %1 : vector<1x32xf32> to vector<8x32xf32>
    %22 = arith.mulf %20, %21 : vector<8x32xf32>
    %23 = vector.broadcast %2 : vector<1x32xf32> to vector<8x32xf32>
    %24 = arith.addf %22, %23 : vector<8x32xf32>
    %25 = arith.truncf %24 : vector<8x32xf32> to vector<8x32xbf16>
    %c0_9 = arith.constant 0 : index
    %c0_10 = arith.constant 0 : index
    %26 = vector.load %arg5[%c0_9, %c0_10] : memref<32x96xbf16, #tpu.memory_space<vmem>>, vector<32x96xbf16>
    %cst_11 = arith.constant dense<0.000000e+00> : vector<8x96xf32>
    %27 = tpu.matmul %25, %26, %cst_11 {dimension_numbers = #tpu.dot_dimension_numbers<[1], [0], [0], [1], [0, 0, 1, 1], [], []>} : vector<8x32xbf16>, vector<32x96xbf16>, vector<8x96xf32> -> vector<8x96xf32>
    %c0_12 = arith.constant 0 : index
    %c0_13 = arith.constant 0 : index
    %28 = vector.load %arg6[%c0_12, %c0_13] : memref<8x8xf32, #tpu.memory_space<vmem>>, vector<8x8xf32>
    %c0_14 = arith.constant 0 : index
    %c0_15 = arith.constant 0 : index
    %29 = vector.load %arg7[%c0_14, %c0_15] : memref<8x8xf32, #tpu.memory_space<vmem>>, vector<8x8xf32>
    %30 = vector.extract_strided_slice %27 {offsets = [0, 0], sizes = [8, 8], strides = [1, 1]} : vector<8x96xf32> to vector<8x8xf32>
    %31 = vector.extract_strided_slice %27 {offsets = [0, 32], sizes = [8, 8], strides = [1, 1]} : vector<8x96xf32> to vector<8x8xf32>
    %32 = vector.extract_strided_slice %27 {offsets = [0, 64], sizes = [8, 8], strides = [1, 1]} : vector<8x96xf32> to vector<8x8xf32>
    %33 = arith.mulf %30, %28 : vector<8x8xf32>
    %34 = vector.extract_strided_slice %30 {offsets = [0, 4], sizes = [8, 4], strides = [1, 1]} : vector<8x8xf32> to vector<8x4xf32>
    %35 = vector.extract_strided_slice %30 {offsets = [0, 0], sizes = [8, 4], strides = [1, 1]} : vector<8x8xf32> to vector<8x4xf32>
    %36 = tpu.concatenate %34, %35 in 1 : vector<8x4xf32>, vector<8x4xf32> -> vector<8x8xf32>
    %37 = arith.mulf %36, %29 : vector<8x8xf32>
    %38 = arith.addf %33, %37 : vector<8x8xf32>
    %cst_16 = arith.constant 0.353553385 : f32
    %39 = vector.broadcast %cst_16 : f32 to vector<8x8xf32>
    %40 = arith.mulf %38, %39 : vector<8x8xf32>
    %41 = arith.truncf %40 : vector<8x8xf32> to vector<8x8xbf16>
    %c0_17 = arith.constant 0 : index
    %c0_18 = arith.constant 0 : index
    %c0_19 = arith.constant 0 : index
    %42 = vector.load %arg8[%c0_17, %c0_18, %c0_19] : memref<4x8x8xbf16, #tpu.memory_space<vmem>>, vector<1x8x8xbf16>
    %43 = vector.shape_cast %42 : vector<1x8x8xbf16> to vector<8x8xbf16>
    %44 = vector.shape_cast %41 : vector<8x8xbf16> to vector<1x8x8xbf16>
    tpu.vector_store %arg8[%c0_17, %c0_18, %c0_19], %44 {strides = array<i32>} : memref<4x8x8xbf16, #tpu.memory_space<vmem>>, vector<1x8x8xbf16>,
    %45 = arith.mulf %31, %28 : vector<8x8xf32>
    %46 = vector.extract_strided_slice %31 {offsets = [0, 4], sizes = [8, 4], strides = [1, 1]} : vector<8x8xf32> to vector<8x4xf32>
    %47 = vector.extract_strided_slice %31 {offsets = [0, 0], sizes = [8, 4], strides = [1, 1]} : vector<8x8xf32> to vector<8x4xf32>
    %48 = tpu.concatenate %46, %47 in 1 : vector<8x4xf32>, vector<8x4xf32> -> vector<8x8xf32>
    %49 = arith.mulf %48, %29 : vector<8x8xf32>
    %50 = arith.addf %45, %49 : vector<8x8xf32>
    %51 = arith.truncf %50 : vector<8x8xf32> to vector<8x8xbf16>
    %c0_20 = arith.constant 0 : index
    %c0_21 = arith.constant 0 : index
    %c0_22 = arith.constant 0 : index
    %52 = vector.load %arg9[%c0_20, %c0_21, %c0_22] : memref<4x8x8xbf16, #tpu.memory_space<vmem>>, vector<1x8x8xbf16>
    %53 = vector.shape_cast %52 : vector<1x8x8xbf16> to vector<8x8xbf16>
    %54 = vector.shape_cast %51 : vector<8x8xbf16> to vector<1x8x8xbf16>
    tpu.vector_store %arg9[%c0_20, %c0_21, %c0_22], %54 {strides = array<i32>} : memref<4x8x8xbf16, #tpu.memory_space<vmem>>, vector<1x8x8xbf16>,
    %55 = arith.truncf %32 : vector<8x8xf32> to vector<8x8xbf16>
    %c0_23 = arith.constant 0 : index
    %c0_24 = arith.constant 0 : index
    %c0_25 = arith.constant 0 : index
    %56 = vector.load %arg10[%c0_23, %c0_24, %c0_25] : memref<4x8x8xbf16, #tpu.memory_space<vmem>>, vector<1x8x8xbf16>
    %57 = vector.shape_cast %56 : vector<1x8x8xbf16> to vector<8x8xbf16>
    %58 = vector.shape_cast %55 : vector<8x8xbf16> to vector<1x8x8xbf16>
    tpu.vector_store %arg10[%c0_23, %c0_24, %c0_25], %58 {strides = array<i32>} : memref<4x8x8xbf16, #tpu.memory_space<vmem>>, vector<1x8x8xbf16>,
    %59 = vector.extract_strided_slice %27 {offsets = [0, 8], sizes = [8, 8], strides = [1, 1]} : vector<8x96xf32> to vector<8x8xf32>
    %60 = vector.extract_strided_slice %27 {offsets = [0, 40], sizes = [8, 8], strides = [1, 1]} : vector<8x96xf32> to vector<8x8xf32>
    %61 = vector.extract_strided_slice %27 {offsets = [0, 72], sizes = [8, 8], strides = [1, 1]} : vector<8x96xf32> to vector<8x8xf32>
    %62 = arith.mulf %59, %28 : vector<8x8xf32>
    %63 = vector.extract_strided_slice %59 {offsets = [0, 4], sizes = [8, 4], strides = [1, 1]} : vector<8x8xf32> to vector<8x4xf32>
    %64 = vector.extract_strided_slice %59 {offsets = [0, 0], sizes = [8, 4], strides = [1, 1]} : vector<8x8xf32> to vector<8x4xf32>
    %65 = tpu.concatenate %63, %64 in 1 : vector<8x4xf32>, vector<8x4xf32> -> vector<8x8xf32>
    %66 = arith.mulf %65, %29 : vector<8x8xf32>
    %67 = arith.addf %62, %66 : vector<8x8xf32>
    %cst_26 = arith.constant 0.353553385 : f32
    %68 = vector.broadcast %cst_26 : f32 to vector<8x8xf32>
    %69 = arith.mulf %67, %68 : vector<8x8xf32>
    %70 = arith.truncf %69 : vector<8x8xf32> to vector<8x8xbf16>
    %c1 = arith.constant 1 : index
    %c0_27 = arith.constant 0 : index
    %c0_28 = arith.constant 0 : index
    %71 = vector.load %arg8[%c1, %c0_27, %c0_28] : memref<4x8x8xbf16, #tpu.memory_space<vmem>>, vector<1x8x8xbf16>
    %72 = vector.shape_cast %71 : vector<1x8x8xbf16> to vector<8x8xbf16>
    %73 = vector.shape_cast %70 : vector<8x8xbf16> to vector<1x8x8xbf16>
    tpu.vector_store %arg8[%c1, %c0_27, %c0_28], %73 {strides = array<i32>} : memref<4x8x8xbf16, #tpu.memory_space<vmem>>, vector<1x8x8xbf16>,
    %74 = arith.mulf %60, %28 : vector<8x8xf32>
    %75 = vector.extract_strided_slice %60 {offsets = [0, 4], sizes = [8, 4], strides = [1, 1]} : vector<8x8xf32> to vector<8x4xf32>
    %76 = vector.extract_strided_slice %60 {offsets = [0, 0], sizes = [8, 4], strides = [1, 1]} : vector<8x8xf32> to vector<8x4xf32>
    %77 = tpu.concatenate %75, %76 in 1 : vector<8x4xf32>, vector<8x4xf32> -> vector<8x8xf32>
    %78 = arith.mulf %77, %29 : vector<8x8xf32>
    %79 = arith.addf %74, %78 : vector<8x8xf32>
    %80 = arith.truncf %79 : vector<8x8xf32> to vector<8x8xbf16>
    %c1_29 = arith.constant 1 : index
    %c0_30 = arith.constant 0 : index
    %c0_31 = arith.constant 0 : index
    %81 = vector.load %arg9[%c1_29, %c0_30, %c0_31] : memref<4x8x8xbf16, #tpu.memory_space<vmem>>, vector<1x8x8xbf16>
    %82 = vector.shape_cast %81 : vector<1x8x8xbf16> to vector<8x8xbf16>
    %83 = vector.shape_cast %80 : vector<8x8xbf16> to vector<1x8x8xbf16>
    tpu.vector_store %arg9[%c1_29, %c0_30, %c0_31], %83 {strides = array<i32>} : memref<4x8x8xbf16, #tpu.memory_space<vmem>>, vector<1x8x8xbf16>,
    %84 = arith.truncf %61 : vector<8x8xf32> to vector<8x8xbf16>
    %c1_32 = arith.constant 1 : index
    %c0_33 = arith.constant 0 : index
    %c0_34 = arith.constant 0 : index
    %85 = vector.load %arg10[%c1_32, %c0_33, %c0_34] : memref<4x8x8xbf16, #tpu.memory_space<vmem>>, vector<1x8x8xbf16>
    %86 = vector.shape_cast %85 : vector<1x8x8xbf16> to vector<8x8xbf16>
    %87 = vector.shape_cast %84 : vector<8x8xbf16> to vector<1x8x8xbf16>
    tpu.vector_store %arg10[%c1_32, %c0_33, %c0_34], %87 {strides = array<i32>} : memref<4x8x8xbf16, #tpu.memory_space<vmem>>, vector<1x8x8xbf16>,
    %88 = vector.extract_strided_slice %27 {offsets = [0, 16], sizes = [8, 8], strides = [1, 1]} : vector<8x96xf32> to vector<8x8xf32>
    %89 = vector.extract_strided_slice %27 {offsets = [0, 48], sizes = [8, 8], strides = [1, 1]} : vector<8x96xf32> to vector<8x8xf32>
    %90 = vector.extract_strided_slice %27 {offsets = [0, 80], sizes = [8, 8], strides = [1, 1]} : vector<8x96xf32> to vector<8x8xf32>
    %91 = arith.mulf %88, %28 : vector<8x8xf32>
    %92 = vector.extract_strided_slice %88 {offsets = [0, 4], sizes = [8, 4], strides = [1, 1]} : vector<8x8xf32> to vector<8x4xf32>
    %93 = vector.extract_strided_slice %88 {offsets = [0, 0], sizes = [8, 4], strides = [1, 1]} : vector<8x8xf32> to vector<8x4xf32>
    %94 = tpu.concatenate %92, %93 in 1 : vector<8x4xf32>, vector<8x4xf32> -> vector<8x8xf32>
    %95 = arith.mulf %94, %29 : vector<8x8xf32>
    %96 = arith.addf %91, %95 : vector<8x8xf32>
    %cst_35 = arith.constant 0.353553385 : f32
    %97 = vector.broadcast %cst_35 : f32 to vector<8x8xf32>
    %98 = arith.mulf %96, %97 : vector<8x8xf32>
    %99 = arith.truncf %98 : vector<8x8xf32> to vector<8x8xbf16>
    %c2 = arith.constant 2 : index
    %c0_36 = arith.constant 0 : index
    %c0_37 = arith.constant 0 : index
    %100 = vector.load %arg8[%c2, %c0_36, %c0_37] : memref<4x8x8xbf16, #tpu.memory_space<vmem>>, vector<1x8x8xbf16>
    %101 = vector.shape_cast %100 : vector<1x8x8xbf16> to vector<8x8xbf16>
    %102 = vector.shape_cast %99 : vector<8x8xbf16> to vector<1x8x8xbf16>
    tpu.vector_store %arg8[%c2, %c0_36, %c0_37], %102 {strides = array<i32>} : memref<4x8x8xbf16, #tpu.memory_space<vmem>>, vector<1x8x8xbf16>,
    %103 = arith.mulf %89, %28 : vector<8x8xf32>
    %104 = vector.extract_strided_slice %89 {offsets = [0, 4], sizes = [8, 4], strides = [1, 1]} : vector<8x8xf32> to vector<8x4xf32>
    %105 = vector.extract_strided_slice %89 {offsets = [0, 0], sizes = [8, 4], strides = [1, 1]} : vector<8x8xf32> to vector<8x4xf32>
    %106 = tpu.concatenate %104, %105 in 1 : vector<8x4xf32>, vector<8x4xf32> -> vector<8x8xf32>
    %107 = arith.mulf %106, %29 : vector<8x8xf32>
    %108 = arith.addf %103, %107 : vector<8x8xf32>
    %109 = arith.truncf %108 : vector<8x8xf32> to vector<8x8xbf16>
    %c2_38 = arith.constant 2 : index
    %c0_39 = arith.constant 0 : index
    %c0_40 = arith.constant 0 : index
    %110 = vector.load %arg9[%c2_38, %c0_39, %c0_40] : memref<4x8x8xbf16, #tpu.memory_space<vmem>>, vector<1x8x8xbf16>
    %111 = vector.shape_cast %110 : vector<1x8x8xbf16> to vector<8x8xbf16>
    %112 = vector.shape_cast %109 : vector<8x8xbf16> to vector<1x8x8xbf16>
    tpu.vector_store %arg9[%c2_38, %c0_39, %c0_40], %112 {strides = array<i32>} : memref<4x8x8xbf16, #tpu.memory_space<vmem>>, vector<1x8x8xbf16>,
    %113 = arith.truncf %90 : vector<8x8xf32> to vector<8x8xbf16>
    %c2_41 = arith.constant 2 : index
    %c0_42 = arith.constant 0 : index
    %c0_43 = arith.constant 0 : index
    %114 = vector.load %arg10[%c2_41, %c0_42, %c0_43] : memref<4x8x8xbf16, #tpu.memory_space<vmem>>, vector<1x8x8xbf16>
    %115 = vector.shape_cast %114 : vector<1x8x8xbf16> to vector<8x8xbf16>
    %116 = vector.shape_cast %113 : vector<8x8xbf16> to vector<1x8x8xbf16>
    tpu.vector_store %arg10[%c2_41, %c0_42, %c0_43], %116 {strides = array<i32>} : memref<4x8x8xbf16, #tpu.memory_space<vmem>>, vector<1x8x8xbf16>,
    %117 = vector.extract_strided_slice %27 {offsets = [0, 24], sizes = [8, 8], strides = [1, 1]} : vector<8x96xf32> to vector<8x8xf32>
    %118 = vector.extract_strided_slice %27 {offsets = [0, 56], sizes = [8, 8], strides = [1, 1]} : vector<8x96xf32> to vector<8x8xf32>
    %119 = vector.extract_strided_slice %27 {offsets = [0, 88], sizes = [8, 8], strides = [1, 1]} : vector<8x96xf32> to vector<8x8xf32>
    %120 = arith.mulf %117, %28 : vector<8x8xf32>
    %121 = vector.extract_strided_slice %117 {offsets = [0, 4], sizes = [8, 4], strides = [1, 1]} : vector<8x8xf32> to vector<8x4xf32>
    %122 = vector.extract_strided_slice %117 {offsets = [0, 0], sizes = [8, 4], strides = [1, 1]} : vector<8x8xf32> to vector<8x4xf32>
    %123 = tpu.concatenate %121, %122 in 1 : vector<8x4xf32>, vector<8x4xf32> -> vector<8x8xf32>
    %124 = arith.mulf %123, %29 : vector<8x8xf32>
    %125 = arith.addf %120, %124 : vector<8x8xf32>
    %cst_44 = arith.constant 0.353553385 : f32
    %126 = vector.broadcast %cst_44 : f32 to vector<8x8xf32>
    %127 = arith.mulf %125, %126 : vector<8x8xf32>
    %128 = arith.truncf %127 : vector<8x8xf32> to vector<8x8xbf16>
    %c3 = arith.constant 3 : index
    %c0_45 = arith.constant 0 : index
    %c0_46 = arith.constant 0 : index
    %129 = vector.load %arg8[%c3, %c0_45, %c0_46] : memref<4x8x8xbf16, #tpu.memory_space<vmem>>, vector<1x8x8xbf16>
    %130 = vector.shape_cast %129 : vector<1x8x8xbf16> to vector<8x8xbf16>
    %131 = vector.shape_cast %128 : vector<8x8xbf16> to vector<1x8x8xbf16>
    tpu.vector_store %arg8[%c3, %c0_45, %c0_46], %131 {strides = array<i32>} : memref<4x8x8xbf16, #tpu.memory_space<vmem>>, vector<1x8x8xbf16>,
    %132 = arith.mulf %118, %28 : vector<8x8xf32>
    %133 = vector.extract_strided_slice %118 {offsets = [0, 4], sizes = [8, 4], strides = [1, 1]} : vector<8x8xf32> to vector<8x4xf32>
    %134 = vector.extract_strided_slice %118 {offsets = [0, 0], sizes = [8, 4], strides = [1, 1]} : vector<8x8xf32> to vector<8x4xf32>
    %135 = tpu.concatenate %133, %134 in 1 : vector<8x4xf32>, vector<8x4xf32> -> vector<8x8xf32>
    %136 = arith.mulf %135, %29 : vector<8x8xf32>
    %137 = arith.addf %132, %136 : vector<8x8xf32>
    %138 = arith.truncf %137 : vector<8x8xf32> to vector<8x8xbf16>
    %c3_47 = arith.constant 3 : index
    %c0_48 = arith.constant 0 : index
    %c0_49 = arith.constant 0 : index
    %139 = vector.load %arg9[%c3_47, %c0_48, %c0_49] : memref<4x8x8xbf16, #tpu.memory_space<vmem>>, vector<1x8x8xbf16>
    %140 = vector.shape_cast %139 : vector<1x8x8xbf16> to vector<8x8xbf16>
    %141 = vector.shape_cast %138 : vector<8x8xbf16> to vector<1x8x8xbf16>
    tpu.vector_store %arg9[%c3_47, %c0_48, %c0_49], %141 {strides = array<i32>} : memref<4x8x8xbf16, #tpu.memory_space<vmem>>, vector<1x8x8xbf16>,
    %142 = arith.truncf %119 : vector<8x8xf32> to vector<8x8xbf16>
    %c3_50 = arith.constant 3 : index
    %c0_51 = arith.constant 0 : index
    %c0_52 = arith.constant 0 : index
    %143 = vector.load %arg10[%c3_50, %c0_51, %c0_52] : memref<4x8x8xbf16, #tpu.memory_space<vmem>>, vector<1x8x8xbf16>
    %144 = vector.shape_cast %143 : vector<1x8x8xbf16> to vector<8x8xbf16>
    %145 = vector.shape_cast %142 : vector<8x8xbf16> to vector<1x8x8xbf16>
    tpu.vector_store %arg10[%c3_50, %c0_51, %c0_52], %145 {strides = array<i32>} : memref<4x8x8xbf16, #tpu.memory_space<vmem>>, vector<1x8x8xbf16>,
    return
  }
  func.func @transform_0(%arg0: i32, %arg1: i32) -> (i32, i32) {
    %c1_i32 = arith.constant 1 : i32
    %0 = arith.muli %arg0, %c1_i32 : i32
    %1 = arith.addi %0, %arg1 : i32
    %c0_i32 = arith.constant 0 : i32
    %c0_i32_0 = arith.constant 0 : i32
    return %1, %c0_i32 : i32, i32
  }
  func.func @transform_1(%arg0: i32, %arg1: i32) -> (i32, i32) {
    %c0_i32 = arith.constant 0 : i32
    %c0_i32_0 = arith.constant 0 : i32
    %c0_i32_1 = arith.constant 0 : i32
    return %c0_i32, %c0_i32_0 : i32, i32
  }
  func.func @transform_2(%arg0: i32, %arg1: i32) -> (i32, i32) {
    %c0_i32 = arith.constant 0 : i32
    %c0_i32_0 = arith.constant 0 : i32
    %c0_i32_1 = arith.constant 0 : i32
    return %c0_i32, %c0_i32_0 : i32, i32
  }
  func.func @transform_3(%arg0: i32, %arg1: i32) -> (i32, i32) {
    %c0_i32 = arith.constant 0 : i32
    %c0_i32_0 = arith.constant 0 : i32
    %c0_i32_1 = arith.constant 0 : i32
    return %c0_i32, %c0_i32_0 : i32, i32
  }
  func.func @transform_4(%arg0: i32, %arg1: i32) -> (i32, i32) {
    %c0_i32 = arith.constant 0 : i32
    %c0_i32_0 = arith.constant 0 : i32
    return %arg1, %c0_i32 : i32, i32
  }
  func.func @transform_5(%arg0: i32, %arg1: i32) -> (i32, i32) {
    %c0_i32 = arith.constant 0 : i32
    %c0_i32_0 = arith.constant 0 : i32
    return %arg1, %c0_i32 : i32, i32
  }
  func.func @transform_6(%arg0: i32, %arg1: i32) -> (i32, i32, i32) {
    %c0_i32 = arith.constant 0 : i32
    %c0_i32_0 = arith.constant 0 : i32
    return %arg0, %arg1, %c0_i32 : i32, i32, i32
  }
  func.func @transform_7(%arg0: i32, %arg1: i32) -> (i32, i32, i32) {
    %c0_i32 = arith.constant 0 : i32
    %c0_i32_0 = arith.constant 0 : i32
    return %arg0, %arg1, %c0_i32 : i32, i32, i32
  }
  func.func @transform_8(%arg0: i32, %arg1: i32) -> (i32, i32, i32) {
    %c0_i32 = arith.constant 0 : i32
    %c0_i32_0 = arith.constant 0 : i32
    return %arg0, %arg1, %c0_i32 : i32, i32, i32
  }
}

module attributes {stable_mosaic.version = 11 : i64} {
  func.func @_attn_mlp_block_kernel(%arg0: i32, %arg1: i32, %arg2: memref<4x8x8xbf16, #tpu.memory_space<vmem>>, %arg3: memref<8x32xf32, #tpu.memory_space<vmem>>, %arg4: memref<32x32xbf16, #tpu.memory_space<vmem>>, %arg5: memref<1x32xf32, #tpu.memory_space<vmem>>, %arg6: memref<1x32xf32, #tpu.memory_space<vmem>>, %arg7: memref<32x128xbf16, #tpu.memory_space<vmem>>, %arg8: memref<1x128xf32, #tpu.memory_space<vmem>>, %arg9: memref<128x32xbf16, #tpu.memory_space<vmem>>, %arg10: memref<1x32xf32, #tpu.memory_space<vmem>>, %arg11: memref<8x32xf32, #tpu.memory_space<vmem>>) attributes {dimension_semantics = [#tpu.dimension_semantics<parallel>, #tpu.dimension_semantics<parallel>], iteration_bounds = array<i64: 2, 1>, scalar_prefetch = 0 : i64, scratch_operands = 0 : i64, tpu.core_type = #tpu.core_type<tc>, window_params = [{transform_indices = @transform_0, window_bounds = array<i64: 4, 8, 8>}, {transform_indices = @transform_1, window_bounds = array<i64: 8, 32>}, {pipeline_mode = #tpu.pipeline_mode<synchronous>, transform_indices = @transform_2, window_bounds = array<i64: 32, 32>}, {pipeline_mode = #tpu.pipeline_mode<synchronous>, transform_indices = @transform_3, window_bounds = array<i64: 1, 32>}, {pipeline_mode = #tpu.pipeline_mode<synchronous>, transform_indices = @transform_4, window_bounds = array<i64: 1, 32>}, {pipeline_mode = #tpu.pipeline_mode<synchronous>, transform_indices = @transform_5, window_bounds = array<i64: 32, 128>}, {pipeline_mode = #tpu.pipeline_mode<synchronous>, transform_indices = @transform_6, window_bounds = array<i64: 1, 128>}, {pipeline_mode = #tpu.pipeline_mode<synchronous>, transform_indices = @transform_7, window_bounds = array<i64: 128, 32>}, {pipeline_mode = #tpu.pipeline_mode<synchronous>, transform_indices = @transform_8, window_bounds = array<i64: 1, 32>}, {transform_indices = @transform_9, window_bounds = array<i64: 8, 32>}]} {
    %c0 = arith.constant 0 : index
    %c0_0 = arith.constant 0 : index
    %c0_1 = arith.constant 0 : index
    %0 = vector.load %arg2[%c0, %c0_0, %c0_1] : memref<4x8x8xbf16, #tpu.memory_space<vmem>>, vector<1x8x8xbf16>
    %1 = vector.shape_cast %0 : vector<1x8x8xbf16> to vector<8x8xbf16>
    %c1 = arith.constant 1 : index
    %c0_2 = arith.constant 0 : index
    %c0_3 = arith.constant 0 : index
    %2 = vector.load %arg2[%c1, %c0_2, %c0_3] : memref<4x8x8xbf16, #tpu.memory_space<vmem>>, vector<1x8x8xbf16>
    %3 = vector.shape_cast %2 : vector<1x8x8xbf16> to vector<8x8xbf16>
    %c2 = arith.constant 2 : index
    %c0_4 = arith.constant 0 : index
    %c0_5 = arith.constant 0 : index
    %4 = vector.load %arg2[%c2, %c0_4, %c0_5] : memref<4x8x8xbf16, #tpu.memory_space<vmem>>, vector<1x8x8xbf16>
    %5 = vector.shape_cast %4 : vector<1x8x8xbf16> to vector<8x8xbf16>
    %c3 = arith.constant 3 : index
    %c0_6 = arith.constant 0 : index
    %c0_7 = arith.constant 0 : index
    %6 = vector.load %arg2[%c3, %c0_6, %c0_7] : memref<4x8x8xbf16, #tpu.memory_space<vmem>>, vector<1x8x8xbf16>
    %7 = vector.shape_cast %6 : vector<1x8x8xbf16> to vector<8x8xbf16>
    %8 = tpu.concatenate %1, %3, %5, %7 in 1 : vector<8x8xbf16>, vector<8x8xbf16>, vector<8x8xbf16>, vector<8x8xbf16> -> vector<8x32xbf16>
    %c0_8 = arith.constant 0 : index
    %c0_9 = arith.constant 0 : index
    %9 = vector.load %arg4[%c0_8, %c0_9] : memref<32x32xbf16, #tpu.memory_space<vmem>>, vector<32x32xbf16>
    %cst = arith.constant dense<0.000000e+00> : vector<8x32xf32>
    %10 = tpu.matmul %8, %9, %cst {dimension_numbers = #tpu.dot_dimension_numbers<[1], [0], [0], [1], [0, 0, 1, 1], [], []>} : vector<8x32xbf16>, vector<32x32xbf16>, vector<8x32xf32> -> vector<8x32xf32>
    %c0_10 = arith.constant 0 : index
    %c0_11 = arith.constant 0 : index
    %11 = vector.load %arg3[%c0_10, %c0_11] : memref<8x32xf32, #tpu.memory_space<vmem>>, vector<8x32xf32>
    %12 = arith.addf %11, %10 : vector<8x32xf32>
    %c0_12 = arith.constant 0 : index
    %c0_13 = arith.constant 0 : index
    %13 = vector.load %arg5[%c0_12, %c0_13] : memref<1x32xf32, #tpu.memory_space<vmem>>, vector<1x32xf32>
    %c0_14 = arith.constant 0 : index
    %c0_15 = arith.constant 0 : index
    %14 = vector.load %arg6[%c0_14, %c0_15] : memref<1x32xf32, #tpu.memory_space<vmem>>, vector<1x32xf32>
    %cst_16 = arith.constant dense<0.000000e+00> : vector<8xf32>
    %15 = vector.multi_reduction <add>, %12, %cst_16 [1] : vector<8x32xf32> to vector<8xf32>
    %16 = vector.shape_cast %15 : vector<8xf32> to vector<8x1xf32>
    %cst_17 = arith.constant 3.200000e+01 : f32
    %17 = vector.broadcast %cst_17 : f32 to vector<8x1xf32>
    %18 = arith.divf %16, %17 : vector<8x1xf32>
    %19 = vector.broadcast %18 : vector<8x1xf32> to vector<8x32xf32>
    %20 = arith.subf %12, %19 : vector<8x32xf32>
    %21 = arith.mulf %20, %20 : vector<8x32xf32>
    %cst_18 = arith.constant dense<0.000000e+00> : vector<8xf32>
    %22 = vector.multi_reduction <add>, %21, %cst_18 [1] : vector<8x32xf32> to vector<8xf32>
    %23 = vector.shape_cast %22 : vector<8xf32> to vector<8x1xf32>
    %cst_19 = arith.constant 3.200000e+01 : f32
    %24 = vector.broadcast %cst_19 : f32 to vector<8x1xf32>
    %25 = arith.divf %23, %24 : vector<8x1xf32>
    %26 = vector.broadcast %18 : vector<8x1xf32> to vector<8x32xf32>
    %27 = arith.subf %12, %26 : vector<8x32xf32>
    %cst_20 = arith.constant 9.99999974E-6 : f32
    %28 = vector.broadcast %cst_20 : f32 to vector<8x1xf32>
    %29 = arith.addf %25, %28 : vector<8x1xf32>
    %30 = math.rsqrt %29 : vector<8x1xf32>
    %31 = vector.broadcast %30 : vector<8x1xf32> to vector<8x32xf32>
    %32 = arith.mulf %27, %31 : vector<8x32xf32>
    %33 = vector.broadcast %13 : vector<1x32xf32> to vector<8x32xf32>
    %34 = arith.mulf %32, %33 : vector<8x32xf32>
    %35 = vector.broadcast %14 : vector<1x32xf32> to vector<8x32xf32>
    %36 = arith.addf %34, %35 : vector<8x32xf32>
    %37 = arith.truncf %36 : vector<8x32xf32> to vector<8x32xbf16>
    %c0_21 = arith.constant 0 : index
    %c0_22 = arith.constant 0 : index
    %38 = vector.load %arg7[%c0_21, %c0_22] : memref<32x128xbf16, #tpu.memory_space<vmem>>, vector<32x128xbf16>
    %cst_23 = arith.constant dense<0.000000e+00> : vector<8x128xf32>
    %39 = tpu.matmul %37, %38, %cst_23 {dimension_numbers = #tpu.dot_dimension_numbers<[1], [0], [0], [1], [0, 0, 1, 1], [], []>} : vector<8x32xbf16>, vector<32x128xbf16>, vector<8x128xf32> -> vector<8x128xf32>
    %c0_24 = arith.constant 0 : index
    %c0_25 = arith.constant 0 : index
    %40 = vector.load %arg8[%c0_24, %c0_25] : memref<1x128xf32, #tpu.memory_space<vmem>>, vector<1x128xf32>
    %41 = vector.broadcast %40 : vector<1x128xf32> to vector<8x128xf32>
    %42 = arith.addf %39, %41 : vector<8x128xf32>
    %cst_26 = arith.constant 5.000000e-01 : f32
    %43 = vector.broadcast %cst_26 : f32 to vector<8x128xf32>
    %44 = arith.mulf %43, %42 : vector<8x128xf32>
    %cst_27 = arith.constant 4.471500e-02 : f32
    %45 = vector.broadcast %cst_27 : f32 to vector<8x128xf32>
    %46 = arith.mulf %45, %42 : vector<8x128xf32>
    %47 = arith.mulf %46, %42 : vector<8x128xf32>
    %48 = arith.mulf %47, %42 : vector<8x128xf32>
    %49 = arith.addf %42, %48 : vector<8x128xf32>
    %cst_28 = arith.constant 0.797884583 : f32
    %50 = vector.broadcast %cst_28 : f32 to vector<8x128xf32>
    %51 = arith.mulf %50, %49 : vector<8x128xf32>
    %52 = math.tanh %51 : vector<8x128xf32>
    %cst_29 = arith.constant 1.000000e+00 : f32
    %53 = vector.broadcast %cst_29 : f32 to vector<8x128xf32>
    %54 = arith.addf %53, %52 : vector<8x128xf32>
    %55 = arith.mulf %44, %54 : vector<8x128xf32>
    %56 = arith.truncf %55 : vector<8x128xf32> to vector<8x128xbf16>
    %c0_30 = arith.constant 0 : index
    %c0_31 = arith.constant 0 : index
    %57 = vector.load %arg9[%c0_30, %c0_31] : memref<128x32xbf16, #tpu.memory_space<vmem>>, vector<128x32xbf16>
    %cst_32 = arith.constant dense<0.000000e+00> : vector<8x32xf32>
    %58 = tpu.matmul %56, %57, %cst_32 {dimension_numbers = #tpu.dot_dimension_numbers<[1], [0], [0], [1], [0, 0, 1, 1], [], []>} : vector<8x128xbf16>, vector<128x32xbf16>, vector<8x32xf32> -> vector<8x32xf32>
    %c0_33 = arith.constant 0 : index
    %c0_34 = arith.constant 0 : index
    %59 = vector.load %arg10[%c0_33, %c0_34] : memref<1x32xf32, #tpu.memory_space<vmem>>, vector<1x32xf32>
    %60 = vector.broadcast %59 : vector<1x32xf32> to vector<8x32xf32>
    %61 = arith.addf %58, %60 : vector<8x32xf32>
    %62 = arith.addf %12, %61 : vector<8x32xf32>
    %c0_35 = arith.constant 0 : index
    %c0_36 = arith.constant 0 : index
    %63 = vector.load %arg11[%c0_35, %c0_36] : memref<8x32xf32, #tpu.memory_space<vmem>>, vector<8x32xf32>
    tpu.vector_store %arg11[%c0_35, %c0_36], %62 {strides = array<i32>} : memref<8x32xf32, #tpu.memory_space<vmem>>, vector<8x32xf32>,
    return
  }
  func.func @transform_0(%arg0: i32, %arg1: i32) -> (i32, i32, i32) {
    %c0_i32 = arith.constant 0 : i32
    %c0_i32_0 = arith.constant 0 : i32
    return %arg0, %arg1, %c0_i32 : i32, i32, i32
  }
  func.func @transform_1(%arg0: i32, %arg1: i32) -> (i32, i32) {
    %c1_i32 = arith.constant 1 : i32
    %0 = arith.muli %arg0, %c1_i32 : i32
    %1 = arith.addi %0, %arg1 : i32
    %c0_i32 = arith.constant 0 : i32
    %c0_i32_0 = arith.constant 0 : i32
    return %1, %c0_i32 : i32, i32
  }
  func.func @transform_2(%arg0: i32, %arg1: i32) -> (i32, i32) {
    %c0_i32 = arith.constant 0 : i32
    %c0_i32_0 = arith.constant 0 : i32
    %c0_i32_1 = arith.constant 0 : i32
    return %c0_i32, %c0_i32_0 : i32, i32
  }
  func.func @transform_3(%arg0: i32, %arg1: i32) -> (i32, i32) {
    %c0_i32 = arith.constant 0 : i32
    %c0_i32_0 = arith.constant 0 : i32
    %c0_i32_1 = arith.constant 0 : i32
    return %c0_i32, %c0_i32_0 : i32, i32
  }
  func.func @transform_4(%arg0: i32, %arg1: i32) -> (i32, i32) {
    %c0_i32 = arith.constant 0 : i32
    %c0_i32_0 = arith.constant 0 : i32
    %c0_i32_1 = arith.constant 0 : i32
    return %c0_i32, %c0_i32_0 : i32, i32
  }
  func.func @transform_5(%arg0: i32, %arg1: i32) -> (i32, i32) {
    %c0_i32 = arith.constant 0 : i32
    %c0_i32_0 = arith.constant 0 : i32
    %c0_i32_1 = arith.constant 0 : i32
    return %c0_i32, %c0_i32_0 : i32, i32
  }
  func.func @transform_6(%arg0: i32, %arg1: i32) -> (i32, i32) {
    %c0_i32 = arith.constant 0 : i32
    %c0_i32_0 = arith.constant 0 : i32
    %c0_i32_1 = arith.constant 0 : i32
    return %c0_i32, %c0_i32_0 : i32, i32
  }
  func.func @transform_7(%arg0: i32, %arg1: i32) -> (i32, i32) {
    %c0_i32 = arith.constant 0 : i32
    %c0_i32_0 = arith.constant 0 : i32
    %c0_i32_1 = arith.constant 0 : i32
    return %c0_i32, %c0_i32_0 : i32, i32
  }
  func.func @transform_8(%arg0: i32, %arg1: i32) -> (i32, i32) {
    %c0_i32 = arith.constant 0 : i32
    %c0_i32_0 = arith.constant 0 : i32
    %c0_i32_1 = arith.constant 0 : i32
    return %c0_i32, %c0_i32_0 : i32, i32
  }
  func.func @transform_9(%arg0: i32, %arg1: i32) -> (i32, i32) {
    %c1_i32 = arith.constant 1 : i32
    %0 = arith.muli %arg0, %c1_i32 : i32
    %1 = arith.addi %0, %arg1 : i32
    %c0_i32 = arith.constant 0 : i32
    %c0_i32_0 = arith.constant 0 : i32
    return %1, %c0_i32 : i32, i32
  }
}

module attributes {stable_mosaic.version = 11 : i64} {
  func.func @_head_logits_lse_kernel(%arg0: i32, %arg1: i32, %arg2: memref<16x32xf32, #tpu.memory_space<vmem>>, %arg3: memref<1x32xf32, #tpu.memory_space<vmem>>, %arg4: memref<1x32xf32, #tpu.memory_space<vmem>>, %arg5: memref<32x128xbf16, #tpu.memory_space<vmem>>, %arg6: memref<1x128xf32, #tpu.memory_space<vmem>>, %arg7: memref<16x128xf32, #tpu.memory_space<vmem>>, %arg8: memref<16x1xf32, #tpu.memory_space<vmem>>, %arg9: memref<16x32xbf16, #tpu.memory_space<vmem>>, %arg10: memref<16x1xf32, #tpu.memory_space<vmem>>, %arg11: memref<16x1xf32, #tpu.memory_space<vmem>>) attributes {dimension_semantics = [#tpu.dimension_semantics<parallel>, #tpu.dimension_semantics<arbitrary>], iteration_bounds = array<i64: 1, 1>, scalar_prefetch = 0 : i64, scratch_operands = 3 : i64, tpu.core_type = #tpu.core_type<tc>, window_params = [{transform_indices = @transform_0, window_bounds = array<i64: 16, 32>}, {pipeline_mode = #tpu.pipeline_mode<synchronous>, transform_indices = @transform_1, window_bounds = array<i64: 1, 32>}, {pipeline_mode = #tpu.pipeline_mode<synchronous>, transform_indices = @transform_2, window_bounds = array<i64: 1, 32>}, {transform_indices = @transform_3, window_bounds = array<i64: 32, 128>}, {transform_indices = @transform_4, window_bounds = array<i64: 1, 128>}, {transform_indices = @transform_5, window_bounds = array<i64: 16, 128>}, {transform_indices = @transform_6, window_bounds = array<i64: 16, 1>}]} {
    %c0_i32 = arith.constant 0 : i32
    %0 = arith.cmpi eq, %arg1, %c0_i32 : i32
    %1 = arith.extui %0 : i1 to i32
    %c0_i32_0 = arith.constant 0 : i32
    %2 = arith.cmpi ne, %1, %c0_i32_0 : i32
    scf.if %2 {
      %c0_22 = arith.constant 0 : index
      %c0_23 = arith.constant 0 : index
      %39 = vector.load %arg2[%c0_22, %c0_23] : memref<16x32xf32, #tpu.memory_space<vmem>>, vector<16x32xf32>
      %c0_24 = arith.constant 0 : index
      %c0_25 = arith.constant 0 : index
      %40 = vector.load %arg3[%c0_24, %c0_25] : memref<1x32xf32, #tpu.memory_space<vmem>>, vector<1x32xf32>
      %c0_26 = arith.constant 0 : index
      %c0_27 = arith.constant 0 : index
      %41 = vector.load %arg4[%c0_26, %c0_27] : memref<1x32xf32, #tpu.memory_space<vmem>>, vector<1x32xf32>
      %cst_28 = arith.constant dense<0.000000e+00> : vector<16xf32>
      %42 = vector.multi_reduction <add>, %39, %cst_28 [1] : vector<16x32xf32> to vector<16xf32>
      %43 = vector.shape_cast %42 : vector<16xf32> to vector<16x1xf32>
      %cst_29 = arith.constant 3.200000e+01 : f32
      %44 = vector.broadcast %cst_29 : f32 to vector<16x1xf32>
      %45 = arith.divf %43, %44 : vector<16x1xf32>
      %46 = vector.broadcast %45 : vector<16x1xf32> to vector<16x32xf32>
      %47 = arith.subf %39, %46 : vector<16x32xf32>
      %48 = arith.mulf %47, %47 : vector<16x32xf32>
      %cst_30 = arith.constant dense<0.000000e+00> : vector<16xf32>
      %49 = vector.multi_reduction <add>, %48, %cst_30 [1] : vector<16x32xf32> to vector<16xf32>
      %50 = vector.shape_cast %49 : vector<16xf32> to vector<16x1xf32>
      %cst_31 = arith.constant 3.200000e+01 : f32
      %51 = vector.broadcast %cst_31 : f32 to vector<16x1xf32>
      %52 = arith.divf %50, %51 : vector<16x1xf32>
      %53 = vector.broadcast %45 : vector<16x1xf32> to vector<16x32xf32>
      %54 = arith.subf %39, %53 : vector<16x32xf32>
      %cst_32 = arith.constant 9.99999974E-6 : f32
      %55 = vector.broadcast %cst_32 : f32 to vector<16x1xf32>
      %56 = arith.addf %52, %55 : vector<16x1xf32>
      %57 = math.rsqrt %56 : vector<16x1xf32>
      %58 = vector.broadcast %57 : vector<16x1xf32> to vector<16x32xf32>
      %59 = arith.mulf %54, %58 : vector<16x32xf32>
      %60 = vector.broadcast %40 : vector<1x32xf32> to vector<16x32xf32>
      %61 = arith.mulf %59, %60 : vector<16x32xf32>
      %62 = vector.broadcast %41 : vector<1x32xf32> to vector<16x32xf32>
      %63 = arith.addf %61, %62 : vector<16x32xf32>
      %64 = arith.truncf %63 : vector<16x32xf32> to vector<16x32xbf16>
      %c0_33 = arith.constant 0 : index
      %c0_34 = arith.constant 0 : index
      %65 = vector.load %arg9[%c0_33, %c0_34] : memref<16x32xbf16, #tpu.memory_space<vmem>>, vector<16x32xbf16>
      tpu.vector_store %arg9[%c0_33, %c0_34], %64 {strides = array<i32>} : memref<16x32xbf16, #tpu.memory_space<vmem>>, vector<16x32xbf16>,
      %cst_35 = arith.constant -1.000000e+30 : f32
      %66 = vector.broadcast %cst_35 : f32 to vector<16x1xf32>
      %c0_36 = arith.constant 0 : index
      %c0_37 = arith.constant 0 : index
      %67 = vector.load %arg10[%c0_36, %c0_37] : memref<16x1xf32, #tpu.memory_space<vmem>>, vector<16x1xf32>
      tpu.vector_store %arg10[%c0_36, %c0_37], %66 {strides = array<i32>} : memref<16x1xf32, #tpu.memory_space<vmem>>, vector<16x1xf32>,
      %cst_38 = arith.constant 0.000000e+00 : f32
      %68 = vector.broadcast %cst_38 : f32 to vector<16x1xf32>
      %c0_39 = arith.constant 0 : index
      %c0_40 = arith.constant 0 : index
      %69 = vector.load %arg11[%c0_39, %c0_40] : memref<16x1xf32, #tpu.memory_space<vmem>>, vector<16x1xf32>
      tpu.vector_store %arg11[%c0_39, %c0_40], %68 {strides = array<i32>} : memref<16x1xf32, #tpu.memory_space<vmem>>, vector<16x1xf32>,
    } else {
    }
    %c0 = arith.constant 0 : index
    %c0_1 = arith.constant 0 : index
    %3 = vector.load %arg9[%c0, %c0_1] : memref<16x32xbf16, #tpu.memory_space<vmem>>, vector<16x32xbf16>
    %c0_2 = arith.constant 0 : index
    %c0_3 = arith.constant 0 : index
    %4 = vector.load %arg5[%c0_2, %c0_3] : memref<32x128xbf16, #tpu.memory_space<vmem>>, vector<32x128xbf16>
    %cst = arith.constant dense<0.000000e+00> : vector<16x128xf32>
    %5 = tpu.matmul %3, %4, %cst {dimension_numbers = #tpu.dot_dimension_numbers<[1], [0], [0], [1], [0, 0, 1, 1], [], []>} : vector<16x32xbf16>, vector<32x128xbf16>, vector<16x128xf32> -> vector<16x128xf32>
    %c0_4 = arith.constant 0 : index
    %c0_5 = arith.constant 0 : index
    %6 = vector.load %arg6[%c0_4, %c0_5] : memref<1x128xf32, #tpu.memory_space<vmem>>, vector<1x128xf32>
    %7 = vector.broadcast %6 : vector<1x128xf32> to vector<16x128xf32>
    %8 = arith.addf %5, %7 : vector<16x128xf32>
    %c0_6 = arith.constant 0 : index
    %c0_7 = arith.constant 0 : index
    %9 = vector.load %arg7[%c0_6, %c0_7] : memref<16x128xf32, #tpu.memory_space<vmem>>, vector<16x128xf32>
    tpu.vector_store %arg7[%c0_6, %c0_7], %8 {strides = array<i32>} : memref<16x128xf32, #tpu.memory_space<vmem>>, vector<16x128xf32>,
    %c128_i32 = arith.constant 128 : i32
    %10 = arith.muli %arg1, %c128_i32 : i32
    %11 = tpu.iota {dimensions = array<i32: 1>} : vector<16x128xi32>
    %12 = vector.broadcast %10 : i32 to vector<16x128xi32>
    %13 = arith.addi %12, %11 : vector<16x128xi32>
    %c12_i32 = arith.constant 12 : i32
    %14 = vector.broadcast %c12_i32 : i32 to vector<16x128xi32>
    %15 = arith.cmpi slt, %13, %14 : vector<16x128xi32>
    %cst_8 = arith.constant -1.000000e+30 : f32
    %16 = vector.broadcast %cst_8 : f32 to vector<16x128xf32>
    %17 = arith.select %15, %8, %16 : vector<16x128xi1>, vector<16x128xf32>
    %c0_9 = arith.constant 0 : index
    %c0_10 = arith.constant 0 : index
    %18 = vector.load %arg10[%c0_9, %c0_10] : memref<16x1xf32, #tpu.memory_space<vmem>>, vector<16x1xf32>
    %cst_11 = arith.constant dense<0xFF800000> : vector<16xf32>
    %19 = vector.multi_reduction <maximumf>, %17, %cst_11 [1] : vector<16x128xf32> to vector<16xf32>
    %20 = vector.shape_cast %19 : vector<16xf32> to vector<16x1xf32>
    %21 = arith.maximumf %18, %20 : vector<16x1xf32>
    %22 = arith.subf %18, %21 : vector<16x1xf32>
    %23 = math.exp %22 : vector<16x1xf32>
    %c0_12 = arith.constant 0 : index
    %c0_13 = arith.constant 0 : index
    %24 = vector.load %arg11[%c0_12, %c0_13] : memref<16x1xf32, #tpu.memory_space<vmem>>, vector<16x1xf32>
    %25 = arith.mulf %23, %24 : vector<16x1xf32>
    %26 = vector.broadcast %21 : vector<16x1xf32> to vector<16x128xf32>
    %27 = arith.subf %17, %26 : vector<16x128xf32>
    %28 = math.exp %27 : vector<16x128xf32>
    %cst_14 = arith.constant 0.000000e+00 : f32
    %29 = vector.broadcast %cst_14 : f32 to vector<16x128xf32>
    %30 = arith.select %15, %28, %29 : vector<16x128xi1>, vector<16x128xf32>
    %cst_15 = arith.constant dense<0.000000e+00> : vector<16xf32>
    %31 = vector.multi_reduction <add>, %30, %cst_15 [1] : vector<16x128xf32> to vector<16xf32>
    %32 = vector.shape_cast %31 : vector<16xf32> to vector<16x1xf32>
    %33 = arith.addf %25, %32 : vector<16x1xf32>
    %c0_16 = arith.constant 0 : index
    %c0_17 = arith.constant 0 : index
    %34 = vector.load %arg11[%c0_16, %c0_17] : memref<16x1xf32, #tpu.memory_space<vmem>>, vector<16x1xf32>
    tpu.vector_store %arg11[%c0_16, %c0_17], %33 {strides = array<i32>} : memref<16x1xf32, #tpu.memory_space<vmem>>, vector<16x1xf32>,
    %c0_18 = arith.constant 0 : index
    %c0_19 = arith.constant 0 : index
    %35 = vector.load %arg10[%c0_18, %c0_19] : memref<16x1xf32, #tpu.memory_space<vmem>>, vector<16x1xf32>
    tpu.vector_store %arg10[%c0_18, %c0_19], %21 {strides = array<i32>} : memref<16x1xf32, #tpu.memory_space<vmem>>, vector<16x1xf32>,
    %c0_i32_20 = arith.constant 0 : i32
    %36 = arith.cmpi eq, %arg1, %c0_i32_20 : i32
    %37 = arith.extui %36 : i1 to i32
    %c0_i32_21 = arith.constant 0 : i32
    %38 = arith.cmpi ne, %37, %c0_i32_21 : i32
    scf.if %38 {
      %c0_22 = arith.constant 0 : index
      %c0_23 = arith.constant 0 : index
      %39 = vector.load %arg10[%c0_22, %c0_23] : memref<16x1xf32, #tpu.memory_space<vmem>>, vector<16x1xf32>
      %c0_24 = arith.constant 0 : index
      %c0_25 = arith.constant 0 : index
      %40 = vector.load %arg11[%c0_24, %c0_25] : memref<16x1xf32, #tpu.memory_space<vmem>>, vector<16x1xf32>
      %41 = math.log %40 : vector<16x1xf32>
      %42 = arith.addf %39, %41 : vector<16x1xf32>
      %c0_26 = arith.constant 0 : index
      %c0_27 = arith.constant 0 : index
      %43 = vector.load %arg8[%c0_26, %c0_27] : memref<16x1xf32, #tpu.memory_space<vmem>>, vector<16x1xf32>
      tpu.vector_store %arg8[%c0_26, %c0_27], %42 {strides = array<i32>} : memref<16x1xf32, #tpu.memory_space<vmem>>, vector<16x1xf32>,
    } else {
    }
    return
  }
  func.func @transform_0(%arg0: i32, %arg1: i32) -> (i32, i32) {
    %c0_i32 = arith.constant 0 : i32
    %c0_i32_0 = arith.constant 0 : i32
    return %arg0, %c0_i32 : i32, i32
  }
  func.func @transform_1(%arg0: i32, %arg1: i32) -> (i32, i32) {
    %c0_i32 = arith.constant 0 : i32
    %c0_i32_0 = arith.constant 0 : i32
    %c0_i32_1 = arith.constant 0 : i32
    return %c0_i32, %c0_i32_0 : i32, i32
  }
  func.func @transform_2(%arg0: i32, %arg1: i32) -> (i32, i32) {
    %c0_i32 = arith.constant 0 : i32
    %c0_i32_0 = arith.constant 0 : i32
    %c0_i32_1 = arith.constant 0 : i32
    return %c0_i32, %c0_i32_0 : i32, i32
  }
  func.func @transform_3(%arg0: i32, %arg1: i32) -> (i32, i32) {
    %c0_i32 = arith.constant 0 : i32
    %c0_i32_0 = arith.constant 0 : i32
    return %c0_i32, %arg1 : i32, i32
  }
  func.func @transform_4(%arg0: i32, %arg1: i32) -> (i32, i32) {
    %c0_i32 = arith.constant 0 : i32
    %c0_i32_0 = arith.constant 0 : i32
    return %c0_i32, %arg1 : i32, i32
  }
  func.func @transform_5(%arg0: i32, %arg1: i32) -> (i32, i32) {
    %c0_i32 = arith.constant 0 : i32
    return %arg0, %arg1 : i32, i32
  }
  func.func @transform_6(%arg0: i32, %arg1: i32) -> (i32, i32) {
    %c0_i32 = arith.constant 0 : i32
    %c0_i32_0 = arith.constant 0 : i32
    return %arg0, %c0_i32 : i32, i32
  }
}

module attributes {stable_mosaic.version = 11 : i64} {
  func.func @_head_normalize_kernel(%arg0: i32, %arg1: i32, %arg2: memref<16x128xf32, #tpu.memory_space<vmem>>, %arg3: memref<16x1xf32, #tpu.memory_space<vmem>>, %arg4: memref<16x128xf32, #tpu.memory_space<vmem>>) attributes {dimension_semantics = [#tpu.dimension_semantics<parallel>, #tpu.dimension_semantics<parallel>], iteration_bounds = array<i64: 1, 1>, scalar_prefetch = 0 : i64, scratch_operands = 0 : i64, tpu.core_type = #tpu.core_type<tc>, window_params = [{transform_indices = @transform_0, window_bounds = array<i64: 16, 128>}, {transform_indices = @transform_1, window_bounds = array<i64: 16, 1>}, {transform_indices = @transform_2, window_bounds = array<i64: 16, 128>}]} {
    %c0 = arith.constant 0 : index
    %c0_0 = arith.constant 0 : index
    %0 = vector.load %arg2[%c0, %c0_0] : memref<16x128xf32, #tpu.memory_space<vmem>>, vector<16x128xf32>
    %c128_i32 = arith.constant 128 : i32
    %1 = arith.muli %arg1, %c128_i32 : i32
    %2 = tpu.iota {dimensions = array<i32: 1>} : vector<16x128xi32>
    %3 = vector.broadcast %1 : i32 to vector<16x128xi32>
    %4 = arith.addi %3, %2 : vector<16x128xi32>
    %c12_i32 = arith.constant 12 : i32
    %5 = vector.broadcast %c12_i32 : i32 to vector<16x128xi32>
    %6 = arith.cmpi slt, %4, %5 : vector<16x128xi32>
    %c0_1 = arith.constant 0 : index
    %c0_2 = arith.constant 0 : index
    %7 = vector.load %arg3[%c0_1, %c0_2] : memref<16x1xf32, #tpu.memory_space<vmem>>, vector<16x1xf32>
    %8 = vector.broadcast %7 : vector<16x1xf32> to vector<16x128xf32>
    %9 = arith.subf %0, %8 : vector<16x128xf32>
    %10 = arith.select %6, %9, %0 : vector<16x128xi1>, vector<16x128xf32>
    %c0_3 = arith.constant 0 : index
    %c0_4 = arith.constant 0 : index
    %11 = vector.load %arg4[%c0_3, %c0_4] : memref<16x128xf32, #tpu.memory_space<vmem>>, vector<16x128xf32>
    tpu.vector_store %arg4[%c0_3, %c0_4], %10 {strides = array<i32>} : memref<16x128xf32, #tpu.memory_space<vmem>>, vector<16x128xf32>,
    return
  }
  func.func @transform_0(%arg0: i32, %arg1: i32) -> (i32, i32) {
    %c0_i32 = arith.constant 0 : i32
    return %arg0, %arg1 : i32, i32
  }
  func.func @transform_1(%arg0: i32, %arg1: i32) -> (i32, i32) {
    %c0_i32 = arith.constant 0 : i32
    %c0_i32_0 = arith.constant 0 : i32
    return %arg0, %c0_i32 : i32, i32
  }
  func.func @transform_2(%arg0: i32, %arg1: i32) -> (i32, i32) {
    %c0_i32 = arith.constant 0 : i32
    return %arg0, %arg1 : i32, i32
  }
}

</mosaic_0001>

<bundles_post_ra>
// kernel: radd_forward.9
= control target key start
LH: loop header
LB: loop body
LE: loop exit
PB: predicated region body
PF: predicated region fallthrough
CT: control target
= control target key end

     0   :  { %s637_s12 = smov 0   ;;  %s639_s13 = smov 0   ;;  %s693_s0 = inlined_call_operand.vmem [shape: bf16[8,8,8], index: 0, kind: input, shape index: {}]   ;;  %s694_s1 = inlined_call_operand.vmem [shape: bf16[8,8,8], index: 1, kind: input, shape index: {}]   ;;  %s695_s2 = inlined_call_operand.vmem [shape: bf16[8,8,8], index: 2, kind: input, shape index: {}]   ;;  %s696_s3 = inlined_call_operand.vmem [shape: bf16[8,8,8], index: 3, kind: output, shape index: {}]  }
   0x1   :  { %s641_s14 = smov 0  }
   0x2 LB: > { %s32_s15 = sadd.s32 1, %s607_s13  ;;  %p528_p0 = scmp.ge.s32.totalorder %s611_s14, 1  ;;  %s611_s14 = sphi %s641_s14, %s13_s14   ;;  %s607_s13 = sphi %s639_s13, %s698_s13   ;;  %s603_s12 = sphi %s637_s12, %s697_s12  }
   0x3   : > { %p34_p1 = scmp.ge.s32.totalorder %s32_s15, 8  ;;  %p190_p2 = scmp.lt.s32.totalorder %s611_s14, 9 }
   0x5   : > { %s700_s15 = smov (%p34_p1, %s32_s15), 0  ;;  %p191_p3 = pnand %p528_p0, %p190_p2 }
   0x6   : > { %p232_p4 = scmp.lt.s32.totalorder (!%p191_p3), %s603_s12, 7  ;;  %vm268_vm0 = vcmask (!%p191_p3), 64512   ;;  %v613_v0 = vmov (!%p191_p3), 0.0   ;;  %vm614_vm1 = vmmov (!%p191_p3), 0   ;;  %vm265_vm2 = vcmask (!%p191_p3), 7168  }
   0x7   : > { %194 = sbr.rel (%p191_p3) target bundleno = 823 (0x337), region = 32  ;;  %541 = vmatprep.subr.bf16.mxu0 (!%p191_p3), %v613_v0  ;;  %269 = vst.msk [vmem:[#allocation4] sm:$0xff] (!%p191_p3), %vm268_vm0, %v613_v0  ;;  %543 = vmatprep.mubr.msk.bf16.mxu0 (!%p191_p3), %vm614_vm1, %v613_v0  ;;  %v615_v4 = vmov (!%p191_p3), -inf   ;;  %v616_v10 = vmov (!%p191_p3), 0   ;;  %vm355_vm3 = vcmask (!%p191_p3), 1043456   ;;  %vm415_vm4 = vcmask (!%p191_p3), 60416  }
   0x8   : > { %547 = vmatprep.subr.bf16.mxu1 (!%p191_p3), %v613_v0  ;;  %549 = vmatprep.mubr.msk.bf16.mxu1 (!%p191_p3), %vm614_vm1, %v613_v0  ;;  %266 = vst.msk [vmem:[#allocation2] sm:$0xff] (!%p191_p3), %vm265_vm2, %v615_v4  ;;  %267 = vst.msk [vmem:[#allocation3] sm:$0xff] (!%p191_p3), %vm265_vm2, %v613_v0 }
   0x9   : > { %581 = vset.pattern.permute.xlu0 (!%p191_p3), %v616_v10  ;;  %582 = vset.pattern.permute.xlu1 (!%p191_p3), %v616_v10 }
   0xe   : > { %s702_s12 = smov (!%p232_p4, %s603_s12), 7  ;;  %v343_v31 = vld [vmem:[#allocation4] sm:$0xff] }
   0xf   : > { %s656_s16 = sshll.u32 %s702_s12, 2  ;;  %v319_v11 = vld [vmem:[#allocation2] sm:$0xff]  ;;  %v335_v25 = vld [vmem:[#allocation3] sm:$0xff] }
  0x10   : > { %s245_s19 = scalar_lea.vmem %s694_s1, %s656_s16  ;;  %s238_s22 = scalar_lea.vmem %s693_s0, %s656_s16 }
  0x11   : > { %v271_v1 = vld [vmem:[%s245_s19] sm:$0xf]  ;;  %s252_s25 = scalar_lea.vmem %s695_s2, %s656_s16  ;;  %s259_s28 = scalar_lea.vmem %s696_s3, %s656_s16 }
  0x12   : > { %v277_v2 = vsel %vm268_vm0, %v271_v1, 0  ;;  %v270_v3 = vld [vmem:[%s238_s22] sm:$0xf] }
  0x13   : > { %542 = vmatpush3.bf16.xpose.msra.mxu0 %v277_v2  ;;  %v351_v15 = vld [vmem:[%s252_s25] sm:$0xf] }
  0x14   : > { %v357_v16 = vsel %vm355_vm3, %v351_v15, 0 }
  0x15   : > { %548 = vmatpush3.bf16.msra.mxu1 %v357_v16 }
  0x1a   : > { %544 = vmatmul.mubr.msk.bf16.vlgmr.msra.gmra.mrb[0].mxu0 %vm268_vm0, %v270_v3 }
  0xed   : > { %v313_v5 = vpop.f32.mrb[0].mxu0 }
  0xee   : > { %v545_v6 = vpop.f32.mrb[1].mxu0  ;;  %v320_v7 = vsel %vm268_vm0, %v313_v5, -inf }
  0xef   : > { %321 = vmax.xlane.f32.xlu0 %v320_v7  ;;  %v316_v8 = vpop.f32.mrb[2].mxu0 }
  0xf0   : > { %v546_v9 = vpop.f32.mrb[3].mxu0 }
 0x17c   : > { %v322_v12 = vpop.xlane.xlu0 %321 }
 0x17d   : > { %v323_v13 = vmax.f32 %v319_v11, %v322_v12 }
 0x17f   : > { %v324_v14 = vsub.f32 %v319_v11, %v323_v13  ;;  %401 = vst.msk [vmem:[#allocation2] sm:$0xff] %vm265_vm2, %v323_v13  ;;  %329 = vperm.xlu0 %581, %v323_v13  }
 0x181   : > { %v325_v23 = vmul.f32 1.442695, %v324_v14 }
 0x1fe   : > { %v330_v17 = vpop.permute.xlu0 %329 }
 0x1ff   : > { %v332_v18 = vsub.f32 %v313_v5, %v330_v17 }
 0x201   : > { %v333_v19 = vmul.f32 1.442695, %v332_v18 }
 0x203   : > { %583 = vpow2.f32 %v333_v19 }
 0x204   : > { %585 = vpow2.f32 %v325_v23 }
 0x20d   : > { %v584_v20 = vpop.eup %583 }
 0x20e   : > { %v337_v21 = vsel %vm268_vm0, %v584_v20, 0.0  ;;  %v350_v22 = vpack.c.bf16 %v584_v20, %v584_v20  ;;  %v586_v24 = vpop.eup %585 }
 0x20f   : > { %338 = vadd.xlane.f32.xlu1 %v337_v21  ;;  %v336_v26 = vmul.f32 %v586_v24, %v335_v25 }
 0x210   : > { %550 = vmatmul.mubr.msk.bf16.vlgmr.msra.gmra.mrb[0].mxu1 %vm268_vm0, %v350_v22 }
 0x220   : > { %346 = vperm.xlu1 %582, %v586_v24  }
 0x29c   : > { %v339_v27 = vpop.xlane.xlu1 %338 }
 0x29d   : > { %v340_v28 = vadd.f32 %v339_v27, %v336_v26 }
 0x29f   : > { %342 = vst.msk [vmem:[#allocation3] sm:$0xff] %vm265_vm2, %v340_v28 }
 0x2a0   : > { %v347_v32 = vpop.permute.xlu1 %346 }
 0x2a1   : > { %v349_v33 = vmul.f32 %v347_v32, %v343_v31 }
 0x2a6   : > { %v405_v29 = vld [vmem:[#allocation3] sm:$0xff] }
 0x2a7   : > { %587 = vrcp.f32 %v405_v29 }
 0x2b1   : > { %v588_v30 = vpop.eup %587 }
 0x2b2   : > { %410 = vperm.xlu1 %582, %v588_v30  }
 0x2e3   : > { %v393_v34 = vpop.f32.mrb[0].mxu1 }
 0x2e4   : > { %v399_v35 = vadd.f32 %v393_v34, %v349_v33  ;;  %v551_v36 = vpop.f32.mrb[1].mxu1 }
 0x2e5   : > { %v396_v37 = vpop.f32.mrb[2].mxu1 }
 0x2e6   : > { %400 = vst.msk [vmem:[#allocation4] sm:$0xff] %vm268_vm0, %v399_v35  ;;  %v552_v38 = vpop.f32.mrb[3].mxu1 }
 0x2ed   : > { %v407_v39 = vld [vmem:[#allocation4] sm:$0xff] }
 0x331   : > { %v411_v40 = vpop.permute.xlu1 %410 }
 0x332   : > { %v413_v41 = vmul.f32 %v411_v40, %v407_v39 }
 0x334   : > { %v414_v42 = vpack.c.bf16 %v413_v41, %v413_v41 }
 0x336   : > { %416 = vst.msk [vmem:[%s259_s28] sm:$0xf] %vm415_vm4, %v414_v42 }
 0x337 PF: > { %s13_s14 = sadd.s32 1, %s611_s14   ;;  %s697_s12 = smov %s607_s13 }
 0x338   : > { %p10_p5 = scmp.ge.s32.totalorder %s13_s14, 10   ;;  %s698_s13 = smov %s700_s15 }
 0x33a   :  { %12 = sbr.rel (!%p10_p5) target bundleno = 2 (0x2), region = 76 }

// kernel: radd_forward.8
= control target key start
LH: loop header
LB: loop body
LE: loop exit
PB: predicated region body
PF: predicated region fallthrough
CT: control target
= control target key end

     0   :  { %s1105_s27 = smov 0   ;;  %s1107_s28 = smov 0   ;;  %s1258_s0 = inlined_call_operand.vmem [shape: f32[16,32], index: 0, kind: input, shape index: {}]   ;;  %s1259_s1 = inlined_call_operand.vmem [shape: f32[1,32], index: 1, kind: input, shape index: {}]   ;;  %s1260_s2 = inlined_call_operand.vmem [shape: f32[1,32], index: 2, kind: input, shape index: {}]   ;;  %s1261_s3 = inlined_call_operand.vmem [shape: bf16[32,96], index: 3, kind: input, shape index: {}]   ;;  %s1262_s4 = inlined_call_operand.vmem [shape: f32[8,8], index: 4, kind: input, shape index: {}]   ;;  %s1263_s5 = inlined_call_operand.vmem [shape: f32[8,8], index: 5, kind: input, shape index: {}]   ;;  %s1264_s6 = inlined_call_operand.vmem [shape: bf16[8,8,8], index: 6, kind: output, shape index: {0}]   ;;  %s1265_s7 = inlined_call_operand.vmem [shape: bf16[8,8,8], index: 7, kind: output, shape index: {1}]   ;;  %s1266_s8 = inlined_call_operand.vmem [shape: bf16[8,8,8], index: 8, kind: output, shape index: {2}]  }
   0x1   :  { %s1109_s29 = smov 0  }
   0x2 LB: > { %s31_s30 = sadd.s32 1, %s1028_s28  ;;  %p905_p0 = scmp.ge.s32.totalorder %s1032_s29, 1  ;;  %s1032_s29 = sphi %s1109_s29, %s19_s29   ;;  %s1028_s28 = sphi %s1107_s28, %s1268_s28   ;;  %s1024_s27 = sphi %s1105_s27, %s1267_s27  }
   0x3   : > { %p33_p1 = scmp.ge.s32.totalorder %s31_s30, 2  ;;  %p306_p2 = scmp.lt.s32.totalorder %s1032_s29, 3 }
   0x5   : > { %s1270_s30 = smov (%p33_p1, %s31_s30), 0  ;;  %p307_p3 = pnand %p905_p0, %p306_p2 }
   0x6   : > { %p368_p4 = scmp.lt.s32.totalorder (!%p307_p3), %s1024_s27, 1  ;;  %vm412_vm0 = vcmask (!%p307_p3), 261120   ;;  %v1006_v7 = vld [vmem:[%s1261_s3] sm:$0xff] (!%p307_p3)   ;;  %v1034_v8 = vmov (!%p307_p3), 0.0   ;;  %vm1035_vm1 = vmmov (!%p307_p3), 0   ;;  %v1007_v9 = vld [vmem:[%s1261_s3 + $0x8] sm:$0xff] (!%p307_p3)  }
   0x7   : > { %310 = sbr.rel (%p307_p3) target bundleno = 931 (0x3a3), region = 44  ;;  %948 = vmatprep.subr.bf16.mxu0 (!%p307_p3), %v1034_v8  ;;  %952 = vmatprep.mubr.msk.bf16.mxu0 (!%p307_p3), %vm1035_vm1, %v1034_v8  ;;  %v913_v14 = vld [vmem:[%s1259_s1] ss:$0 sm:$0xff] (!%p307_p3)  ;;  %s1036_s24 = smov (!%p307_p3), 92   ;;  %vm511_vm2 = vcmask (!%p307_p3), 31744   ;;  %vm517_vm3 = vcmask (!%p307_p3), 60416  }
   0x8   : > { %949 = vmatpush3.bf16.msra.mxu0 (!%p307_p3), %v1006_v7  ;;  %v914_v16 = vld [vmem:[%s1260_s2] ss:$0 sm:$0xff] (!%p307_p3)  ;;  %s1037_s25 = smov (!%p307_p3), 124   ;;  %s1038_s26 = smov (!%p307_p3), 32  }
   0x9   : > { %950 = vmatprep.subr.bf16.mxu0 (!%p307_p3), %v1034_v8  ;;  %v501_v20 = vld [vmem:[%s1262_s4] sm:$0xff] (!%p307_p3)  ;;  %s1041_s11 = smov (!%p307_p3), 100   ;;  %s1042_s12 = smov (!%p307_p3), 56  }
   0xa   : > { %s1044_s14 = smov (!%p307_p3), 84   ;;  %s1045_s15 = smov (!%p307_p3), 76   ;;  %v1171_v27 = vld [vmem:[%s1263_s5] sm:$0xff] (!%p307_p3) }
   0xb   : > { %s1046_s16 = smov (!%p307_p3), 68   ;;  %s1047_s17 = smov (!%p307_p3), 8  }
   0xc   : > { %951 = vmatpush3.bf16.msra.mxu0 (!%p307_p3), %v1007_v9  ;;  %s1048_s18 = smov (!%p307_p3), 16   ;;  %s1049_s19 = smov (!%p307_p3), 40  }
   0xd   : > { %s1050_s20 = smov (!%p307_p3), 48   ;;  %s1051_s23 = smov (!%p307_p3), 4  }
   0xe   : > { %s369_s9 = scalar_select %p368_p4, %s1024_s27, 1 }
   0xf   : > { %s1059_s21 = smov 104  }
  0x10   : > { %s906_s10 = sshll.u32 %s369_s9, 3  ;;  %s1039_s9 = smov 116  }
  0x11   : > { %s371_s13 = scalar_lea.vmem %s1258_s0, %s906_s10  ;;  %s1040_s10 = smov 24  }
  0x12   : > { %v409_v0 = vld [vmem:[%s371_s13] sm:$0xff]  ;;  %s1043_s13 = smov 108  }
  0x13   : > { %v413_v1 = vsel %vm412_vm0, %v409_v0, 0.0 }
  0x14   : > { %414 = vadd.xlane.f32.xlu0 %v413_v1 }
  0xa1   : > { %v415_v2 = vpop.xlane.xlu0 %414 }
  0xa2   : > { %v417_v3 = vmul.f32 0.03125, %v415_v2 }
  0xa4   : > { %v418_v4 = vsub.f32 %v409_v0, %v417_v3 }
  0xa6   : > { %v419_v5 = vmul.f32 %v418_v4, %v418_v4 }
  0xa8   : > { %v420_v6 = vsel %vm412_vm0, %v419_v5, 0.0 }
  0xa9   : > { %421 = vadd.xlane.f32.xlu0 %v420_v6 }
 0x136   : > { %v422_v10 = vpop.xlane.xlu0 %421 }
 0x137   : > { %v423_v11 = vmul.f32 0.03125, %v422_v10 }
 0x139   : > { %v424_v12 = vadd.f32 1e-05, %v423_v11 }
 0x13b   : > { %1008 = vrsqrt.f32 %v424_v12 }
 0x145   : > { %v1009_v13 = vpop.eup %1008 }
 0x146   : > { %v426_v15 = vmul.f32 %v1009_v13, %v418_v4 }
 0x148   : > { %v433_v17 = vmul.f32 %v913_v14, %v426_v15 }
 0x14a   : > { %v440_v18 = vadd.f32 %v914_v16, %v433_v17 }
 0x14c   : > { %v441_v19 = vpack.c.bf16 %v440_v18, %v440_v18 }
 0x14e   : > { %953 = vmatmul.mubr.msk.bf16.vlgmr.msra.gmra.mrb[0].mxu0 %vm412_vm0, %v441_v19 }
 0x221   : > { %v1148_v21 = vpop.f32.mrb[0].mxu0 }
 0x222   : > { %524 = vrot.lane.b32.xlu0 %v1148_v21, %s1036_s24  ;;  %505 = vrot.lane.b32.xlu1 %v1148_v21, %s1037_s25  ;;  %v954_v22 = vpop.f32.mrb[1].mxu0  ;;  %v1153_v23 = vmul.f32 %v501_v20, %v1148_v21  ;;  %v1196_v49 = vpack.c.bf16 %v1148_v21, %v1148_v21  ;;  %s1052_s24 = smov 64   ;;  %s907_s25 = sshll.u32 %s1024_s27, 2 }
 0x223   : > { %v498_v24 = vpop.f32.mrb[2].mxu0  ;;  %p382_p5 = scmp.lt.s32.totalorder %s907_s25, 7  ;;  %s1054_s27 = smov 88  }
 0x224   : > { %v955_v25 = vpop.f32.mrb[3].mxu0 }
 0x225   : > { %s1272_s25 = smov (!%p382_p5, %s907_s25), 7 }
 0x226   : > { %520 = vrot.lane.b32.xlu0 %v501_v20, %s1038_s26  ;;  %557 = vrot.lane.b32.xlu1 %v1148_v21, %s1039_s9  ;;  %s1211_s9 = sshll.u32 %s1272_s25, 2 }
 0x22a   : > { %657 = vrot.lane.b32.xlu0 %v501_v20, %s1040_s10  ;;  %527 = vrot.lane.b32.xlu1 %v1148_v21, %s1041_s11  ;;  %s1056_s11 = smov 112  }
 0x22e   : > { %678 = vrot.lane.b32.xlu0 %v501_v20, %s1042_s12  ;;  %609 = vrot.lane.b32.xlu1 %v1148_v21, %s1043_s13 }
 0x232   : > { %581 = vrot.lane.b32.xlu1 %v1148_v21, %s1044_s14  ;;  %s1219_s14 = scalar_lea.vmem %s1266_s8, %s1211_s9 }
 0x236   : > { %633 = vrot.lane.b32.xlu1 %v1148_v21, %s1045_s15  ;;  %s1057_s15 = smov 120  }
 0x23a   : > { %682 = vrot.lane.b32.xlu1 %v1148_v21, %s1046_s16  ;;  %s1058_s16 = smov 72  }
 0x23e   : > { %553 = vrot.lane.b32.xlu1 %v501_v20, %s1047_s17 }
 0x242   : > { %605 = vrot.lane.b32.xlu1 %v501_v20, %s1048_s18 }
 0x246   : > { %577 = vrot.lane.b32.xlu1 %v501_v20, %s1049_s19 }
 0x24a   : > { %629 = vrot.lane.b32.xlu1 %v501_v20, %s1050_s20 }
 0x294   : > { %v1166_v26 = vpop.permute.xlu1 %505  ;;  %v525_v31 = vpop.permute.xlu0 %524 }
 0x298   : > { %v558_v28 = vpop.permute.xlu1 %557  ;;  %v521_v51 = vpop.permute.xlu0 %520 }
 0x299   : > { %v560_v29 = vsel %vm511_vm2, %v558_v28, %v1166_v26  ;;  %v523_v57 = vmul.f32 %v521_v51, %v1148_v21 }
 0x29a   : > { %v561_v30 = vmul.f32 %v560_v29, %v1171_v27 }
 0x29c   : > { %563 = vrot.lane.b32.xlu0 %v561_v30, %s1047_s17  ;;  %v528_v32 = vpop.permute.xlu1 %527  ;;  %v658_v53 = vpop.permute.xlu0 %657 }
 0x29d   : > { %v530_v33 = vsel %vm511_vm2, %v525_v31, %v528_v32  ;;  %v660_v11 = vmul.f32 %v658_v53, %v1148_v21 }
 0x29e   : > { %v531_v34 = vmul.f32 %v530_v33, %v1171_v27 }
 0x2a0   : > { %533 = vrot.lane.b32.xlu1 %v531_v34, %s1038_s26  ;;  %v610_v35 = vpop.permute.xlu1 %609  ;;  %v679_v55 = vpop.permute.xlu0 %678  ;;  %s1053_s26 = smov 96  }
 0x2a1   : > { %v612_v36 = vsel %vm511_vm2, %v610_v35, %v558_v28  ;;  %v661_v37 = vsel %vm511_vm2, %v528_v32, %v610_v35  ;;  %v681_v13 = vmul.f32 %v679_v55, %v1148_v21 }
 0x2a2   : > { %v613_v38 = vmul.f32 %v612_v36, %v1171_v27  ;;  %v662_v39 = vmul.f32 %v661_v37, %v1171_v27 }
 0x2a4   : > { %664 = vrot.lane.b32.xlu1 %v662_v39, %s1040_s10  ;;  %615 = vrot.lane.b32.xlu0 %v613_v38, %s1048_s18  ;;  %v582_v40 = vpop.permute.xlu1 %581  ;;  %s1055_s10 = smov 80  }
 0x2a5   : > { %v584_v41 = vsel %vm511_vm2, %v582_v40, %v525_v31 }
 0x2a6   : > { %v585_v42 = vmul.f32 %v584_v41, %v1171_v27 }
 0x2a8   : > { %587 = vrot.lane.b32.xlu0 %v585_v42, %s1049_s19  ;;  %v634_v43 = vpop.permute.xlu1 %633 }
 0x2a9   : > { %v636_v44 = vsel %vm511_vm2, %v634_v43, %v582_v40 }
 0x2aa   : > { %v637_v45 = vmul.f32 %v636_v44, %v1171_v27 }
 0x2ac   : > { %639 = vrot.lane.b32.xlu1 %v637_v45, %s1050_s20  ;;  %v683_v46 = vpop.permute.xlu1 %682 }
 0x2ad   : > { %v685_v47 = vsel %vm511_vm2, %v683_v46, %v634_v43 }
 0x2ae   : > { %v686_v48 = vmul.f32 %v685_v47, %v1171_v27 }
 0x2b0   : > { %508 = vrot.lane.b32.xlu1 %v1148_v21, %s1051_s23  ;;  %688 = vrot.lane.b32.xlu0 %v686_v48, %s1042_s12  ;;  %v554_v50 = vpop.permute.xlu1 %553 }
 0x2b1   : > { %v556_v4 = vmul.f32 %v554_v50, %v1148_v21 }
 0x2b4   : > { %600 = vrot.lane.b32.xlu0 %v1196_v49, %s1042_s12  ;;  %549 = vrot.lane.b32.xlu1 %v1196_v49, %s1052_s24  ;;  %v606_v52 = vpop.permute.xlu1 %605  ;;  %s397_s24 = scalar_lea.vmem %s1265_s7, %s1211_s9 }
 0x2b5   : > { %v608_v63 = vmul.f32 %v606_v52, %v1148_v21 }
 0x2b8   : > { %652 = vrot.lane.b32.xlu1 %v1196_v49, %s1050_s20  ;;  %v578_v54 = vpop.permute.xlu1 %577  ;;  %s388_s20 = scalar_lea.vmem %s1264_s6, %s1211_s9 }
 0x2b9   : > { %v580_v0 = vmul.f32 %v578_v54, %v1148_v21 }
 0x2bc   : > { %v630_v56 = vpop.permute.xlu1 %629 }
 0x2bd   : > { %v632_v6 = vmul.f32 %v630_v56, %v1148_v21 }
 0x30e   : > { %v564_v58 = vpop.permute.xlu0 %563 }
 0x30f   : > { %v566_v7 = vadd.f32 %v564_v58, %v556_v4 }
 0x311   : > { %v567_v14 = vmul.f32 0.35355338, %v566_v7 }
 0x312   : > { %v534_v59 = vpop.permute.xlu1 %533 }
 0x313   : > { %v536_v60 = vadd.f32 %v534_v59, %v523_v57  ;;  %v939_v24 = vpack.c.bf16 %v567_v14, %v567_v14 }
 0x315   : > { %v937_v61 = vpack.c.bf16 %v536_v60, %v536_v60 }
 0x316   : > { %v616_v62 = vpop.permute.xlu0 %615  ;;  %v665_v2 = vpop.permute.xlu1 %664 }
 0x317   : > { %541 = vrot.lane.b32.xlu0 %v937_v61, %s1053_s26  ;;  %v618_v1 = vadd.f32 %v616_v62, %v608_v63  ;;  %v667_v16 = vadd.f32 %v665_v2, %v660_v11 }
 0x319   : > { %v619_v8 = vmul.f32 0.35355338, %v618_v1  ;;  %v668_v25 = vmul.f32 0.35355338, %v667_v16 }
 0x31a   : > { %v588_v3 = vpop.permute.xlu0 %587 }
 0x31b   : > { %v590_v5 = vadd.f32 %v588_v3, %v580_v0  ;;  %v941_v15 = vpack.c.bf16 %v619_v8, %v619_v8 }
 0x31d   : > { %v940_v9 = vpack.c.bf16 %v590_v5, %v590_v5 }
 0x31e   : > { %v640_v10 = vpop.permute.xlu1 %639 }
 0x31f   : > { %v642_v12 = vadd.f32 %v640_v10, %v632_v6  ;;  %595 = vrot.lane.b32.xlu1 %v940_v9, %s1054_s27 }
 0x321   : > { %v942_v17 = vpack.c.bf16 %v642_v12, %v642_v12 }
 0x322   : > { %v689_v18 = vpop.permute.xlu0 %688  ;;  %v509_v19 = vpop.permute.xlu1 %508 }
 0x323   : > { %v691_v20 = vadd.f32 %v689_v18, %v681_v13  ;;  %v512_v22 = vsel %vm511_vm2, %v1166_v26, %v509_v19  ;;  %647 = vrot.lane.b32.xlu0 %v942_v17, %s1055_s10  ;;  %624 = vrot.lane.b32.xlu1 %v941_v15, %s1056_s11 }
 0x324   : > { %v513_v21 = vmul.f32 %v512_v22, %v1171_v27  ;;  %v943_v27 = vpack.c.bf16 %v668_v25, %v668_v25 }
 0x325   : > { %v944_v28 = vpack.c.bf16 %v691_v20, %v691_v20 }
 0x326   : > { %v514_v26 = vadd.f32 %v513_v21, %v1153_v23  ;;  %v601_v29 = vpop.permute.xlu0 %600  ;;  %v550_v30 = vpop.permute.xlu1 %549 }
 0x327   : > { %552 = vst.msk [vmem:[%s1219_s14] sm:$0xf] %vm517_vm3, %v550_v30  ;;  %572 = vrot.lane.b32.xlu0 %v939_v24, %s1057_s15  ;;  %696 = vrot.lane.b32.xlu1 %v944_v28, %s1058_s16  ;;  %924 = vst.msk [vmem:[%s1219_s14 + $0x4] sm:$0xf] %vm517_vm3, %v601_v29 }
 0x328   : > { %v515_v31 = vmul.f32 0.35355338, %v514_v26 }
 0x32a   : > { %v516_v32 = vpack.c.bf16 %v515_v31, %v515_v31  ;;  %v653_v33 = vpop.permute.xlu1 %652 }
 0x32b   : > { %929 = vst.msk [vmem:[%s1219_s14 + $0x8] sm:$0xf] %vm517_vm3, %v653_v33  ;;  %673 = vrot.lane.b32.xlu0 %v943_v27, %s1059_s21 }
 0x32c   : > { %518 = vst.msk [vmem:[%s388_s20] sm:$0xf] %vm517_vm3, %v516_v32 }
 0x32f   : > { %701 = vrot.lane.b32.xlu0 %v1196_v49, %s1049_s19 }
 0x389   : > { %v542_v23 = vpop.permute.xlu0 %541 }
 0x38a   : > { %544 = vst.msk [vmem:[%s397_s24] sm:$0xf] %vm517_vm3, %v542_v23 }
 0x391   : > { %v596_v34 = vpop.permute.xlu1 %595 }
 0x392   : > { %923 = vst.msk [vmem:[%s397_s24 + $0x4] sm:$0xf] %vm517_vm3, %v596_v34 }
 0x395   : > { %v648_v35 = vpop.permute.xlu0 %647  ;;  %v625_v36 = vpop.permute.xlu1 %624 }
 0x396   : > { %928 = vst.msk [vmem:[%s397_s24 + $0x8] sm:$0xf] %vm517_vm3, %v648_v35  ;;  %926 = vst.msk [vmem:[%s388_s20 + $0x8] sm:$0xf] %vm517_vm3, %v625_v36 }
 0x399   : > { %v573_v37 = vpop.permute.xlu0 %572  ;;  %v697_v38 = vpop.permute.xlu1 %696 }
 0x39a   : > { %921 = vst.msk [vmem:[%s388_s20 + $0x4] sm:$0xf] %vm517_vm3, %v573_v37  ;;  %933 = vst.msk [vmem:[%s397_s24 + $0xc] sm:$0xf] %vm517_vm3, %v697_v38 }
 0x39d   : > { %v674_v39 = vpop.permute.xlu0 %673 }
 0x39e   : > { %931 = vst.msk [vmem:[%s388_s20 + $0xc] sm:$0xf] %vm517_vm3, %v674_v39 }
 0x3a1   : > { %v702_v40 = vpop.permute.xlu0 %701 }
 0x3a2   : > { %934 = vst.msk [vmem:[%s1219_s14 + $0xc] sm:$0xf] %vm517_vm3, %v702_v40 }
 0x3a3 PF: > { %s19_s29 = sadd.s32 1, %s1032_s29   ;;  %s1267_s27 = smov %s1028_s28 }
 0x3a4   : > { %p16_p6 = scmp.ge.s32.totalorder %s19_s29, 4   ;;  %s1268_s28 = smov %s1270_s30 }
 0x3a6   :  { %18 = sbr.rel (!%p16_p6) target bundleno = 2 (0x2), region = 113 }

// kernel: radd_forward.10
= control target key start
LH: loop header
LB: loop body
LE: loop exit
PB: predicated region body
PF: predicated region fallthrough
CT: control target
= control target key end

     0   :  { %s992_s30 = smov 0   ;;  %s994_s10 = smov 0   ;;  %s1116_s0 = inlined_call_operand.vmem [shape: bf16[8,8,8], index: 0, kind: input, shape index: {}]   ;;  %s1117_s1 = inlined_call_operand.vmem [shape: f32[16,32], index: 1, kind: input, shape index: {}]   ;;  %s1118_s2 = inlined_call_operand.vmem [shape: bf16[32,32], index: 2, kind: input, shape index: {}]   ;;  %s1119_s3 = inlined_call_operand.vmem [shape: f32[1,32], index: 3, kind: input, shape index: {}]   ;;  %s1120_s4 = inlined_call_operand.vmem [shape: f32[1,32], index: 4, kind: input, shape index: {}]   ;;  %s1121_s5 = inlined_call_operand.vmem [shape: bf16[32,128], index: 5, kind: input, shape index: {}]   ;;  %s1122_s6 = inlined_call_operand.vmem [shape: f32[1,128], index: 6, kind: input, shape index: {}]   ;;  %s1123_s7 = inlined_call_operand.vmem [shape: bf16[128,32], index: 7, kind: input, shape index: {}]   ;;  %s1124_s8 = inlined_call_operand.vmem [shape: f32[1,32], index: 8, kind: input, shape index: {}]   ;;  %s1125_s9 = inlined_call_operand.vmem [shape: f32[16,32], index: 9, kind: output, shape index: {}]  }
   0x1   :  { %s996_s11 = smov 0  }
   0x2 LB: > { %s31_s12 = sadd.s32 1, %s931_s10  ;;  %p783_p0 = scmp.ge.s32.totalorder %s935_s11, 1  ;;  %s935_s11 = sphi %s996_s11, %s19_s11   ;;  %s931_s10 = sphi %s994_s10, %s1127_s10   ;;  %s927_s30 = sphi %s992_s30, %s1126_s30  }
   0x3   : > { %p33_p1 = scmp.ge.s32.totalorder %s31_s12, 2  ;;  %p320_p2 = scmp.lt.s32.totalorder %s935_s11, 3 }
   0x5   : > { %s1129_s12 = smov (%p33_p1, %s31_s12), 0  ;;  %p321_p3 = pnand %p783_p0, %p320_p2 }
   0x6   : > { %s784_s13 = sshll.u32 (!%p321_p3), %s927_s30, 2  ;;  %v897_v0 = vld [vmem:[%s1118_s2] sm:$0xff] (!%p321_p3)   ;;  %v937_v1 = vmov (!%p321_p3), 0.0   ;;  %v898_v2 = vld [vmem:[%s1118_s2 + $0x8] sm:$0xff] (!%p321_p3)   ;;  %vm938_vm0 = vmmov (!%p321_p3), 0   ;;  %s939_s22 = smov (!%p321_p3), 8  }
   0x7   : > { %324 = sbr.rel (%p321_p3) target bundleno = 1126 (0x466), region = 56  ;;  %p365_p4 = scmp.lt.s32.totalorder (!%p321_p3), %s784_s13, 7  ;;  %829 = vmatprep.subr.bf16.mxu1 (!%p321_p3), %v937_v1  ;;  %845 = vmatprep.subr.bf16.mxu0 (!%p321_p3), %v937_v1  ;;  %vm408_vm1 = vcmask (!%p321_p3), 64512   ;;  %vm412_vm2 = vcmask (!%p321_p3), 130048   ;;  %vm415_vm3 = vcmask (!%p321_p3), 195584   ;;  %vm434_vm4 = vcmask (!%p321_p3), 261120  }
   0x8   : > { %830 = vmatpush3.bf16.msra.mxu1 (!%p321_p3), %v897_v0  ;;  %833 = vmatprep.mubr.msk.bf16.mxu1 (!%p321_p3), %vm938_vm0, %v937_v1  ;;  %s940_s23 = smov (!%p321_p3), 24   ;;  %s941_s24 = smov (!%p321_p3), 16   ;;  %v899_v25 = vld [vmem:[%s1121_s5] sm:$0xff] (!%p321_p3)   ;;  %v900_v26 = vld [vmem:[%s1121_s5 + $0x8] sm:$0xff] (!%p321_p3)   ;;  %v903_v39 = vld [vmem:[%s1123_s7 + $0x10] sm:$0xff] (!%p321_p3)  }
   0x9   : > { %831 = vmatprep.subr.bf16.mxu1 (!%p321_p3), %v937_v1  ;;  %861 = vmatprep.mubr.msk.bf16.mxu0 (!%p321_p3), %vm938_vm0, %v937_v1  ;;  %p374_p5 = scmp.lt.s32.totalorder (!%p321_p3), %s927_s30, 1  ;;  %v901_v27 = vld [vmem:[%s1123_s7] sm:$0xff] (!%p321_p3)   ;;  %v902_v38 = vld [vmem:[%s1123_s7 + $0x8] sm:$0xff] (!%p321_p3)   ;;  %v904_v40 = vld [vmem:[%s1123_s7 + $0x18] sm:$0xff] (!%p321_p3)  }
   0xa   : > { %846 = vmatpush3.bf16.msra.mxu0 (!%p321_p3), %v901_v27  ;;  %v797_v32 = vld [vmem:[%s1119_s3] ss:$0 sm:$0xff] (!%p321_p3)  ;;  %v906_v42 = vld [vmem:[%s1123_s7 + $0x28] sm:$0xff] (!%p321_p3)   ;;  %v907_v43 = vld [vmem:[%s1123_s7 + $0x30] sm:$0xff] (!%p321_p3)  }
   0xb   : > { %847 = vmatprep.subr.bf16.mxu0 (!%p321_p3), %v937_v1  ;;  %v798_v34 = vld [vmem:[%s1120_s4] ss:$0 sm:$0xff] (!%p321_p3)  ;;  %v908_v44 = vld [vmem:[%s1123_s7 + $0x38] sm:$0xff] (!%p321_p3)  }
   0xc   : > { %832 = vmatpush3.bf16.msra.mxu1 (!%p321_p3), %v898_v2  ;;  %v905_v41 = vld [vmem:[%s1123_s7 + $0x20] sm:$0xff] (!%p321_p3)  }
   0xd   : > { %837 = vmatprep.subr.bf16.mxu1 (!%p321_p3), %v937_v1  ;;  %v799_v45 = vld [vmem:[%s1122_s6] ss:$0 sm:$0xff] (!%p321_p3) }
   0xe   : > { %s1131_s13 = smov (!%p365_p4, %s784_s13), 7  ;;  %s1133_s30 = smov (!%p374_p5, %s927_s30), 1  ;;  %848 = vmatpush3.bf16.msra.mxu0 %v902_v38  ;;  %v803_v61 = vld [vmem:[%s1124_s8] ss:$0 sm:$0xff] }
   0xf   : > { %s785_s18 = sshll.u32 %s1131_s13, 2  ;;  %s786_s25 = sshll.u32 %s1133_s30, 3  ;;  %849 = vmatprep.subr.bf16.mxu0 %v937_v1 }
  0x10   : > { %s371_s21 = scalar_lea.vmem %s1116_s0, %s785_s18  ;;  %s377_s28 = scalar_lea.vmem %s1117_s1, %s786_s25 }
  0x11   : > { %v894_v3 = vld [vmem:[%s371_s21 + $0x4] ss:$0 sps:$4 sm:$0xff]   ;;  %v896_v4 = vld [vmem:[%s371_s21 + $0xc] ss:$0 sps:$4 sm:$0xff]   ;;  %v895_v5 = vld [vmem:[%s371_s21 + $0x8] ss:$0 sps:$4 sm:$0xff]   ;;  %s383_s27 = scalar_lea.vmem %s1125_s9, %s786_s25 }
  0x12   : > { %396 = vrot.lane.b32.xlu0 %v894_v3, %s939_s22  ;;  %406 = vrot.lane.b32.xlu1 %v896_v4, %s940_s23  ;;  %v386_v7 = vld [vmem:[%s371_s21] sm:$0xf] }
  0x13   : > { %v477_v13 = vld [vmem:[%s377_s28] sm:$0xff]  ;;  %850 = vmatpush3.bf16.msra.mxu0 %v903_v39 }
  0x14   : > { %851 = vmatprep.subr.bf16.mxu0 %v937_v1 }
  0x16   : > { %401 = vrot.lane.b32.xlu0 %v895_v5, %s941_s24 }
  0x17   : > { %852 = vmatpush3.bf16.msra.mxu0 %v904_v40 }
  0x18   : > { %853 = vmatprep.subr.bf16.mxu0 %v937_v1 }
  0x1b   : > { %854 = vmatpush3.bf16.msra.mxu0 %v905_v41 }
  0x1c   : > { %855 = vmatprep.subr.bf16.mxu0 %v937_v1 }
  0x1f   : > { %856 = vmatpush3.bf16.msra.mxu0 %v906_v42 }
  0x20   : > { %857 = vmatprep.subr.bf16.mxu0 %v937_v1 }
  0x23   : > { %858 = vmatpush3.bf16.msra.mxu0 %v907_v43 }
  0x24   : > { %859 = vmatprep.subr.bf16.mxu0 %v937_v1 }
  0x27   : > { %860 = vmatpush3.bf16.msra.mxu0 %v908_v44 }
  0x84   : > { %v397_v6 = vpop.permute.xlu0 %396  ;;  %v407_v8 = vpop.permute.xlu1 %406 }
  0x85   : > { %v411_v9 = vsel %vm408_vm1, %v386_v7, %v397_v6 }
  0x88   : > { %v402_v10 = vpop.permute.xlu0 %401 }
  0x89   : > { %v414_v11 = vsel %vm412_vm2, %v411_v9, %v402_v10 }
  0x8a   : > { %v417_v12 = vsel %vm415_vm3, %v414_v11, %v407_v8 }
  0x8b   : > { %834 = vmatmul.mubr.msk.bf16.vlgmr.msra.gmra.mrb[0].mxu1 %vm434_vm4, %v417_v12 }
  0x8c   : > { %841 = vmatprep.mubr.msk.bf16.mxu1 %vm938_vm0, %v937_v1  ;;  %838 = vmatpush3.bf16.msra.mxu1 %v899_v25 }
  0x8d   : > { %839 = vmatprep.subr.bf16.mxu1 %v937_v1 }
  0x90   : > { %840 = vmatpush3.bf16.msra.mxu1 %v900_v26 }
 0x15e   : > { %v471_v14 = vpop.f32.mrb[0].mxu1 }
 0x15f   : > { %v1043_v15 = vadd.f32 %v477_v13, %v471_v14  ;;  %v835_v16 = vpop.f32.mrb[1].mxu1 }
 0x160   : > { %v474_v17 = vpop.f32.mrb[2].mxu1 }
 0x161   : > { %v836_v18 = vpop.f32.mrb[3].mxu1  ;;  %v481_v19 = vsel %vm434_vm4, %v1043_v15, 0.0 }
 0x162   : > { %482 = vadd.xlane.f32.xlu1 %v481_v19 }
 0x1ef   : > { %v483_v20 = vpop.xlane.xlu1 %482 }
 0x1f0   : > { %v485_v21 = vmul.f32 0.03125, %v483_v20 }
 0x1f2   : > { %v486_v22 = vsub.f32 %v1043_v15, %v485_v21 }
 0x1f4   : > { %v487_v23 = vmul.f32 %v486_v22, %v486_v22 }
 0x1f6   : > { %v488_v24 = vsel %vm434_vm4, %v487_v23, 0.0 }
 0x1f7   : > { %489 = vadd.xlane.f32.xlu0 %v488_v24 }
 0x284   : > { %v490_v28 = vpop.xlane.xlu0 %489 }
 0x285   : > { %v491_v29 = vmul.f32 0.03125, %v490_v28 }
 0x287   : > { %v492_v30 = vadd.f32 1e-05, %v491_v29 }
 0x289   : > { %909 = vrsqrt.f32 %v492_v30 }
 0x293   : > { %v910_v31 = vpop.eup %909 }
 0x294   : > { %v494_v33 = vmul.f32 %v910_v31, %v486_v22 }
 0x296   : > { %v501_v35 = vmul.f32 %v797_v32, %v494_v33 }
 0x298   : > { %v508_v36 = vadd.f32 %v798_v34, %v501_v35 }
 0x29a   : > { %v509_v37 = vpack.c.bf16 %v508_v36, %v508_v36 }
 0x29c   : > { %842 = vmatmul.mubr.msk.bf16.vlgmr.msra.gmra.mrb[4].mxu1 %vm434_vm4, %v509_v37 }
 0x36f   : > { %v570_v46 = vpop.f32.mrb[4].mxu1 }
 0x370   : > { %v571_v47 = vadd.f32 %v799_v45, %v570_v46  ;;  %v843_v48 = vpop.f32.mrb[5].mxu1 }
 0x371   : > { %v573_v49 = vpop.f32.mrb[6].mxu1 }
 0x372   : > { %v577_v50 = vmul.f32 0.044715, %v571_v47  ;;  %v844_v51 = vpop.f32.mrb[7].mxu1  ;;  %v576_v57 = vmul.f32 0.5, %v571_v47 }
 0x374   : > { %v578_v52 = vmul.f32 %v577_v50, %v571_v47 }
 0x376   : > { %v579_v53 = vmul.f32 %v578_v52, %v571_v47 }
 0x378   : > { %v580_v54 = vadd.f32 %v579_v53, %v571_v47 }
 0x37a   : > { %v581_v55 = vmul.f32 0.7978846, %v580_v54 }
 0x37c   : > { %911 = vtanh.f32 %v581_v55 }
 0x386   : > { %v912_v56 = vpop.eup %911 }
 0x387   : > { %v583_v58 = vadd.f32 1.0, %v912_v56 }
 0x389   : > { %v584_v59 = vmul.f32 %v583_v58, %v576_v57 }
 0x38b   : > { %v585_v60 = vpack.c.bf16 %v584_v59, %v584_v59 }
 0x38d   : > { %862 = vmatmul.mubr.bf16.vlgmr.msra.gmra.mrb[0].mxu0 %v585_v60 }
 0x460   : > { %v691_v62 = vpop.f32.mrb[0].mxu0 }
 0x461   : > { %v692_v63 = vadd.f32 %v803_v61, %v691_v62  ;;  %v863_v0 = vpop.f32.mrb[1].mxu0 }
 0x462   : > { %v694_v1 = vpop.f32.mrb[2].mxu0 }
 0x463   : > { %v697_v2 = vadd.f32 %v692_v63, %v1043_v15  ;;  %v864_v3 = vpop.f32.mrb[3].mxu0 }
 0x465   : > { %698 = vst.msk [vmem:[%s383_s27] sm:$0xff] %vm434_vm4, %v697_v2 }
 0x466 PF: > { %s19_s11 = sadd.s32 1, %s935_s11   ;;  %s1126_s30 = smov %s931_s10 }
 0x467   : > { %p16_p6 = scmp.ge.s32.totalorder %s19_s11, 4   ;;  %s1127_s10 = smov %s1129_s12 }
 0x469   :  { %18 = sbr.rel (!%p16_p6) target bundleno = 2 (0x2), region = 92 }

// kernel: radd_forward.14
= control target key start
LH: loop header
LB: loop body
LE: loop exit
PB: predicated region body
PF: predicated region fallthrough
CT: control target
= control target key end

     0   :  { %vm31_vm0 = vcmask 261120   ;;  %v272_v15 = vmov 0.0   ;;  %vm273_vm1 = vmmov 0   ;;  %vm77_vm2 = vcmask 7168   ;;  %s364_s0 = inlined_call_operand.vmem [shape: f32[16,32], index: 0, kind: input, shape index: {}]   ;;  %s365_s3 = inlined_call_operand.vmem [shape: bf16[32,128], index: 3, kind: input, shape index: {}]   ;;  %s366_s1 = inlined_call_operand.vmem [shape: f32[1,32], index: 1, kind: input, shape index: {}]   ;;  %s367_s2 = inlined_call_operand.vmem [shape: f32[1,32], index: 2, kind: input, shape index: {}]   ;;  %s368_s4 = inlined_call_operand.vmem [shape: f32[1,128], index: 4, kind: input, shape index: {}]   ;;  %s369_s5 = inlined_call_operand.vmem [shape: f32[16,128], index: 5, kind: output, shape index: {0}]   ;;  %s370_s6 = inlined_call_operand.vmem [shape: f32[16,1], index: 6, kind: output, shape index: {1}]  }
   0x1   :  { %v27_v0 = vld [vmem:[%s364_s0] sm:$0xff]  ;;  %v28_v1 = vld [vmem:[%s364_s0 + $0x8] sm:$0xff]  ;;  %240 = vmatprep.subr.bf16.mxu0 %v272_v15  ;;  %244 = vmatprep.mubr.msk.bf16.mxu0 %vm273_vm1, %v272_v15  ;;  %v274_v35 = vmov -1e+30   ;;  %80 = vst.msk [vmem:[#allocation4] sm:$0xff] %vm77_vm2, %v272_v15  ;;  %81 = vst.msk [vmem:[#allocation4 + $0x8] sm:$0xff] %vm77_vm2, %v272_v15  ;;  %v154_v36 = vlaneseq }
   0x2   :  { %v32_v2 = vsel %vm31_vm0, %v27_v0, 0.0  ;;  %v35_v3 = vsel %vm31_vm0, %v28_v1, 0.0  ;;  %v254_v14 = vld [vmem:[%s365_s3] sm:$0xff]   ;;  %v255_v16 = vld [vmem:[%s365_s3 + $0x8] sm:$0xff]   ;;  %78 = vst.msk [vmem:[#allocation3] sm:$0xff] %vm77_vm2, %v274_v35  ;;  %79 = vst.msk [vmem:[#allocation3 + $0x8] sm:$0xff] %vm77_vm2, %v274_v35 }
   0x3   :  { %33 = vadd.xlane.f32.xlu0 %v32_v2  ;;  %241 = vmatpush3.bf16.msra.mxu0 %v254_v14  ;;  %v231_v25 = vld [vmem:[%s366_s1] ss:$0 sm:$0xff]  ;;  %v155_v37 = vand.u32 127, %v154_v36  ;;  %v275_v47 = vmov 0  }
   0x4   :  { %242 = vmatprep.subr.bf16.mxu0 %v272_v15  ;;  %v232_v29 = vld [vmem:[%s367_s2] ss:$0 sm:$0xff]  ;;  %252 = vset.pattern.permute.xlu0 %v275_v47 }
   0x5   :  { %v233_v38 = vld [vmem:[%s368_s4] ss:$0 sm:$0xff]  ;;  %vm158_vm3 = vcmp.lt.s32.totalorder %v155_v37, 12  ;;  %253 = vset.pattern.permute.xlu1 %v275_v47 }
   0x7   :  { %36 = vadd.xlane.f32.xlu0 %v35_v3  ;;  %243 = vmatpush3.bf16.msra.mxu0 %v255_v16 }
   0x9   :  { %v161_v48 = vld [vmem:[#allocation3] sm:$0xff]  ;;  %v162_v50 = vld [vmem:[#allocation3 + $0x8] sm:$0xff] }
  0x90   :  { %v34_v4 = vpop.xlane.xlu0 %33 }
  0x91   :  { %v39_v5 = vmul.f32 0.03125, %v34_v4 }
  0x93   :  { %v41_v6 = vsub.f32 %v27_v0, %v39_v5  ;;  %v175_v5 = vld [vmem:[#allocation4] sm:$0xff] }
  0x94   :  { %v37_v7 = vpop.xlane.xlu0 %36 }
  0x95   :  { %v40_v8 = vmul.f32 0.03125, %v37_v7  ;;  %v43_v9 = vmul.f32 %v41_v6, %v41_v6  ;;  %v176_v7 = vld [vmem:[#allocation4 + $0x8] sm:$0xff] }
  0x97   :  { %v42_v10 = vsub.f32 %v28_v1, %v40_v8  ;;  %v45_v11 = vsel %vm31_vm0, %v43_v9, 0.0 }
  0x98   :  { %46 = vadd.xlane.f32.xlu1 %v45_v11 }
  0x99   :  { %v44_v12 = vmul.f32 %v42_v10, %v42_v10 }
  0x9b   :  { %v48_v13 = vsel %vm31_vm0, %v44_v12, 0.0 }
  0x9c   :  { %49 = vadd.xlane.f32.xlu1 %v48_v13 }
 0x125   :  { %v47_v17 = vpop.xlane.xlu1 %46 }
 0x126   :  { %v51_v18 = vmul.f32 0.03125, %v47_v17 }
 0x128   :  { %v53_v19 = vadd.f32 1e-05, %v51_v18 }
 0x129   :  { %v50_v20 = vpop.xlane.xlu1 %49 }
 0x12a   :  { %256 = vrsqrt.f32 %v53_v19  ;;  %v52_v21 = vmul.f32 0.03125, %v50_v20 }
 0x12c   :  { %v54_v22 = vadd.f32 1e-05, %v52_v21 }
 0x12e   :  { %258 = vrsqrt.f32 %v54_v22 }
 0x134   :  { %v257_v23 = vpop.eup %256 }
 0x135   :  { %v57_v24 = vmul.f32 %v257_v23, %v41_v6 }
 0x137   :  { %v65_v27 = vmul.f32 %v231_v25, %v57_v24 }
 0x138   :  { %v259_v26 = vpop.eup %258 }
 0x139   :  { %v58_v28 = vmul.f32 %v259_v26, %v42_v10  ;;  %v73_v31 = vadd.f32 %v232_v29, %v65_v27 }
 0x13b   :  { %v66_v30 = vmul.f32 %v231_v25, %v58_v28 }
 0x13d   :  { %v74_v32 = vadd.f32 %v232_v29, %v66_v30 }
 0x13f   :  { %v75_v33 = vpack.c.bf16 %v74_v32, %v73_v31 }
 0x141   :  { %76 = vst.msk [vmem:[#allocation2] sm:$0xff] %vm31_vm0, %v75_v33 }
 0x148   :  { %v82_v34 = vld [vmem:[#allocation2] sm:$0xff] }
 0x149   :  { %245 = vmatmul.mubr.msk.bf16.vlgmr.msra.gmra.mrb[0].mxu0 %vm31_vm0, %v82_v34 }
 0x21c   :  { %v144_v39 = vpop.f32.mrb[0].mxu0 }
 0x21d   :  { %v145_v40 = vadd.f32 %v233_v38, %v144_v39  ;;  %v246_v41 = vpop.f32.mrb[1].mxu0 }
 0x21e   :  { %v147_v42 = vpop.f32.mrb[2].mxu0 }
 0x21f   :  { %151 = vst [vmem:[%s369_s5] sm:$0xff] %v145_v40  ;;  %v148_v43 = vadd.f32 %v233_v38, %v147_v42  ;;  %v247_v44 = vpop.f32.mrb[3].mxu0  ;;  %v159_v45 = vsel %vm158_vm3, %v145_v40, -1e+30 }
 0x220   :  { %163 = vmax.xlane.f32.xlu0 %v159_v45 }
 0x221   :  { %152 = vst [vmem:[%s369_s5 + $0x8] sm:$0xff] %v148_v43  ;;  %v160_v46 = vsel %vm158_vm3, %v148_v43, -1e+30 }
 0x222   :  { %165 = vmax.xlane.f32.xlu1 %v160_v46 }
 0x2ad   :  { %v164_v49 = vpop.xlane.xlu0 %163 }
 0x2ae   :  { %v167_v51 = vmax.f32 %v161_v48, %v164_v49 }
 0x2af   :  { %v166_v52 = vpop.xlane.xlu1 %165 }
 0x2b0   :  { %v169_v53 = vsub.f32 %v161_v48, %v167_v51  ;;  %206 = vst.msk [vmem:[#allocation3] sm:$0xff] %vm77_vm2, %v167_v51  ;;  %v168_v54 = vmax.f32 %v162_v50, %v166_v52  ;;  %181 = vperm.xlu0 %252, %v167_v51  }
 0x2b2   :  { %v170_v55 = vsub.f32 %v162_v50, %v168_v54  ;;  %207 = vst.msk [vmem:[#allocation3 + $0x8] sm:$0xff] %vm77_vm2, %v168_v54  ;;  %186 = vperm.xlu1 %253, %v168_v54   ;;  %v171_v2 = vmul.f32 1.442695, %v169_v53 }
 0x2b4   :  { %v173_v3 = vmul.f32 1.442695, %v170_v55 }
 0x2b7   :  { %v211_v19 = vld [vmem:[#allocation3] sm:$0xff] }
 0x2b9   :  { %v212_v22 = vld [vmem:[#allocation3 + $0x8] sm:$0xff] }
 0x32f   :  { %v182_v56 = vpop.permute.xlu0 %181 }
 0x330   :  { %v189_v57 = vsub.f32 %v159_v45, %v182_v56 }
 0x331   :  { %v187_v58 = vpop.permute.xlu1 %186 }
 0x332   :  { %v191_v59 = vmul.f32 1.442695, %v189_v57  ;;  %v190_v60 = vsub.f32 %v160_v46, %v187_v58 }
 0x334   :  { %260 = vpow2.f32 %v191_v59  ;;  %v193_v61 = vmul.f32 1.442695, %v190_v60 }
 0x336   :  { %262 = vpow2.f32 %v193_v61 }
 0x337   :  { %264 = vpow2.f32 %v171_v2 }
 0x338   :  { %266 = vpow2.f32 %v173_v3 }
 0x33e   :  { %v261_v62 = vpop.eup %260 }
 0x33f   :  { %v195_v63 = vsel %vm158_vm3, %v261_v62, 0.0 }
 0x340   :  { %v263_v0 = vpop.eup %262  ;;  %197 = vadd.xlane.f32.xlu1 %v195_v63 }
 0x341   :  { %v196_v1 = vsel %vm158_vm3, %v263_v0, 0.0  ;;  %v265_v4 = vpop.eup %264 }
 0x342   :  { %199 = vadd.xlane.f32.xlu0 %v196_v1  ;;  %v267_v6 = vpop.eup %266  ;;  %v177_v8 = vmul.f32 %v265_v4, %v175_v5 }
 0x343   :  { %v178_v11 = vmul.f32 %v267_v6, %v176_v7 }
 0x3cd   :  { %v198_v9 = vpop.xlane.xlu1 %197 }
 0x3ce   :  { %v201_v10 = vadd.f32 %v198_v9, %v177_v8 }
 0x3cf   :  { %v200_v12 = vpop.xlane.xlu0 %199 }
 0x3d0   :  { %204 = vst.msk [vmem:[#allocation4] sm:$0xff] %vm77_vm2, %v201_v10  ;;  %v202_v13 = vadd.f32 %v200_v12, %v178_v11 }
 0x3d2   :  { %205 = vst.msk [vmem:[#allocation4 + $0x8] sm:$0xff] %vm77_vm2, %v202_v13 }
 0x3d7   :  { %v213_v14 = vld [vmem:[#allocation4] sm:$0xff] }
 0x3d8   :  { %268 = vlog2.f32 %v213_v14 }
 0x3d9   :  { %v214_v15 = vld [vmem:[#allocation4 + $0x8] sm:$0xff] }
 0x3da   :  { %270 = vlog2.f32 %v214_v15 }
 0x3e2   :  { %v269_v16 = vpop.eup %268 }
 0x3e3   :  { %v216_v17 = vmul.f32 0.6931472, %v269_v16 }
 0x3e4   :  { %v271_v18 = vpop.eup %270 }
 0x3e5   :  { %v219_v20 = vadd.f32 %v216_v17, %v211_v19  ;;  %v218_v21 = vmul.f32 0.6931472, %v271_v18 }
 0x3e7   :  { %221 = vst.msk [vmem:[%s370_s6] sm:$0xff] %vm77_vm2, %v219_v20  ;;  %v220_v23 = vadd.f32 %v218_v21, %v212_v22 }
 0x3e9   :  { %222 = vst.msk [vmem:[%s370_s6 + $0x8] sm:$0xff] %vm77_vm2, %v220_v23 }

// kernel: radd_forward.15
= control target key start
LH: loop header
LB: loop body
LE: loop exit
PB: predicated region body
PF: predicated region fallthrough
CT: control target
= control target key end

     0   :  { %v43_v0 = vmov 0   ;;  %v14_v3 = vlaneseq  ;;  %s77_s1 = inlined_call_operand.vmem [shape: f32[16,1], index: 1, kind: input, shape index: {}]   ;;  %s78_s0 = inlined_call_operand.vmem [shape: f32[16,128], index: 0, kind: input, shape index: {}]   ;;  %s79_s2 = inlined_call_operand.vmem [shape: f32[16,128], index: 2, kind: output, shape index: {}]  }
   0x1   :  { %42 = vset.pattern.permute.xlu0 %v43_v0  ;;  %v19_v1 = vld [vmem:[%s77_s1] sm:$0xff]  ;;  %v20_v2 = vld [vmem:[%s77_s1 + $0x8] sm:$0xff] }
   0x2   :  { %23 = vperm.xlu0 %42, %v19_v1   ;;  %v15_v4 = vand.u32 127, %v14_v3  ;;  %v11_v5 = vld [vmem:[%s78_s0] sm:$0xff]  ;;  %v12_v8 = vld [vmem:[%s78_s0 + $0x8] sm:$0xff] }
   0x4   :  { %vm18_vm0 = vcmp.lt.s32.totalorder %v15_v4, 12 }
   0x6   :  { %28 = vperm.xlu0 %42, %v20_v2  }
  0x81   :  { %v24_v6 = vpop.permute.xlu0 %23 }
  0x82   :  { %v31_v7 = vsub.f32 %v11_v5, %v24_v6 }
  0x84   :  { %v33_v9 = vsel %vm18_vm0, %v31_v7, %v11_v5 }
  0x85   :  { %35 = vst [vmem:[%s79_s2] sm:$0xff] %v33_v9  ;;  %v29_v10 = vpop.permute.xlu0 %28 }
  0x86   :  { %v32_v11 = vsub.f32 %v12_v8, %v29_v10 }
  0x88   :  { %v34_v12 = vsel %vm18_vm0, %v32_v11, %v12_v8 }
  0x89   :  { %36 = vst [vmem:[%s79_s2 + $0x8] sm:$0xff] %v34_v12 }

</bundles_post_ra>
